<compile_context>
chip_gen: v7x
topology: tpu7x:2x2x1
jax: 0.10.0
libtpu: 0.0.40
codegen_flags: <defaults>
</compile_context>

<pallas_src>
import functools
import math

import jax
import jax.numpy as jnp
from jax.experimental import pallas as pl
from jax.experimental.pallas import tpu as pltpu


def _conv_add_kernel(x_ref, w_ref, off_ref, o_ref, *, C, KH, KW, OH, OW):
    # x_ref   : (1, C, H, W)  one image, VMEM
    # w_ref   : (C*KH*KW,)    flattened conv weight, SMEM scalars
    # off_ref : (1,)          bias + x1 folded into one scalar, SMEM
    # o_ref   : (1, OH, OW)   conv(x0) + bias + x1, VMEM (lane-dense last dim)
    acc = jnp.zeros((OH, OW), jnp.float32)
    # Statically unrolled shifted-MAC formulation of the valid conv:
    #   out[oh, ow] = sum_{c,kh,kw} x[c, oh+kh, ow+kw] * w[c, kh, kw]
    for c in range(C):
        for kh in range(KH):
            for kw in range(KW):
                tap = x_ref[0, c, pl.ds(kh, OH), pl.ds(kw, OW)]      # (OH, OW)
                acc = acc + tap * w_ref[c * KH * KW + kh * KW + kw]  # VPU MAC
    o_ref[0] = acc + off_ref[0]


def conv_add_dev1(x0, x1, weight, bias):
    """Forward of ConvAddDev1: conv2d(x0, weight, bias, valid padding) + x1."""
    N, C, H, W = x0.shape
    CO, KC, KH, KW = weight.shape
    assert KC == C and CO == 1
    OH, OW = H - KH + 1, W - KW + 1
    assert x1.size == 1, "x[1] is a broadcast scalar in this module"

    x0 = x0.astype(jnp.float32)
    wflat = weight.astype(jnp.float32).reshape(C * KH * KW)
    # Fold conv bias and the broadcast residual scalar into a single SMEM scalar.
    offset = (bias.astype(jnp.float32).reshape(()) +
              x1.astype(jnp.float32).reshape(())).reshape(1)

    kernel = functools.partial(
        _conv_add_kernel, C=C, KH=KH, KW=KW, OH=OH, OW=OW)

    out = pl.pallas_call(
        kernel,
        out_shape=jax.ShapeDtypeStruct((N, OH, OW), jnp.float32),
        grid=(N,),
        in_specs=[
            # One full image per grid step; (H, W) are full extents so the
            # (8,128) rule is satisfied. Double-buffered by BlockSpec.
            pl.BlockSpec((1, C, H, W), lambda n: (n, 0, 0, 0)),
            pl.BlockSpec(memory_space=pltpu.MemorySpace.SMEM),  # weights
            pl.BlockSpec(memory_space=pltpu.MemorySpace.SMEM),  # bias + x1
        ],
        out_specs=pl.BlockSpec((1, OH, OW), lambda n: (n, 0, 0)),
        compiler_params=pltpu.CompilerParams(
            dimension_semantics=("parallel",)),  # shard batch across TCs (v7x)
    )(x0, wflat, offset)

    # Free layout plumbing back to PyTorch NCHW.
    return out.reshape(N, 1, OH, OW)


def make_params(key):
    """Deterministic parameters matching ConvAddDev1.__init__ shapes."""
    C_in, C_out, KH, KW = 4, 1, 4, 4
    weight = jnp.ones((C_out, C_in, KH, KW), jnp.float32)  # module sets weight to ones
    fan_in = C_in * KH * KW
    bound = 1.0 / math.sqrt(fan_in)                        # PyTorch default bias init range
    bias = jax.random.uniform(key, (C_out,), jnp.float32, minval=-bound, maxval=bound)
    return weight, bias


if __name__ == "__main__":
    key = jax.random.PRNGKey(0)
    k_x0, k_x1, k_b = jax.random.split(key, 3)

    # Small shapes consistent with the module (Conv2d(4, 1, 4) needs C=4, H,W >= 4).
    x0 = jax.random.normal(k_x0, (2, 4, 16, 16), jnp.float32)  # NCHW
    x1 = jax.random.normal(k_x1, (1, 1, 1, 1), jnp.float32)    # broadcast-added term

    weight, bias = make_params(k_b)

    out = conv_add_dev1(x0, x1, weight, bias)
    out = jax.block_until_ready(out)

    # Reference check in plain JAX (lax conv).
    ref = jax.lax.conv_general_dilated(
        x0, weight, window_strides=(1, 1), padding="VALID",
        dimension_numbers=("NCHW", "OIHW", "NCHW"),
    ) + bias.reshape(1, 1, 1, 1) + x1
    assert out.shape == (2, 1, 13, 13)
    assert jnp.allclose(out, ref, rtol=1e-4, atol=1e-4), "mismatch vs reference conv"

    print("KERNEL_OK")
</pallas_src>

<mosaic_0001>
module attributes {stable_mosaic.version = 11 : i64} {
  func.func @_conv_add_kernel(%arg0: i32, %arg1: memref<1x4x16x16xf32, #tpu.memory_space<vmem>>, %arg2: memref<64xf32, #tpu.memory_space<smem>>, %arg3: memref<1xf32, #tpu.memory_space<smem>>, %arg4: memref<1x13x13xf32, #tpu.memory_space<vmem>>) attributes {dimension_semantics = [#tpu.dimension_semantics<parallel>], iteration_bounds = array<i64: 2>, scalar_prefetch = 0 : i64, scratch_operands = 0 : i64, tpu.core_type = #tpu.core_type<tc>, window_params = [{transform_indices = @transform_0, window_bounds = array<i64: 1, 4, 16, 16>}, {transform_indices = @transform_1, window_bounds = array<i64: 64>}, {transform_indices = @transform_2, window_bounds = array<i64: 1>}, {transform_indices = @transform_3, window_bounds = array<i64: 1, 13, 13>}]} {
    %cst = arith.constant 0.000000e+00 : f32
    %0 = vector.broadcast %cst : f32 to vector<13x13xf32>
    %c0 = arith.constant 0 : index
    %c0_0 = arith.constant 0 : index
    %c0_1 = arith.constant 0 : index
    %c0_2 = arith.constant 0 : index
    %1 = vector.load %arg1[%c0, %c0_0, %c0_1, %c0_2] : memref<1x4x16x16xf32, #tpu.memory_space<vmem>>, vector<1x1x13x13xf32>
    %2 = vector.shape_cast %1 : vector<1x1x13x13xf32> to vector<13x13xf32>
    %c0_3 = arith.constant 0 : index
    %3 = memref.load %arg2[%c0_3] : memref<64xf32, #tpu.memory_space<smem>>
    %4 = vector.broadcast %3 : f32 to vector<13x13xf32>
    %5 = arith.mulf %2, %4 : vector<13x13xf32>
    %6 = arith.addf %0, %5 : vector<13x13xf32>
    %c0_4 = arith.constant 0 : index
    %c0_5 = arith.constant 0 : index
    %c0_6 = arith.constant 0 : index
    %c1 = arith.constant 1 : index
    %7 = vector.load %arg1[%c0_4, %c0_5, %c0_6, %c1] : memref<1x4x16x16xf32, #tpu.memory_space<vmem>>, vector<1x1x13x13xf32>
    %8 = vector.shape_cast %7 : vector<1x1x13x13xf32> to vector<13x13xf32>
    %c1_7 = arith.constant 1 : index
    %9 = memref.load %arg2[%c1_7] : memref<64xf32, #tpu.memory_space<smem>>
    %10 = vector.broadcast %9 : f32 to vector<13x13xf32>
    %11 = arith.mulf %8, %10 : vector<13x13xf32>
    %12 = arith.addf %6, %11 : vector<13x13xf32>
    %c0_8 = arith.constant 0 : index
    %c0_9 = arith.constant 0 : index
    %c0_10 = arith.constant 0 : index
    %c2 = arith.constant 2 : index
    %13 = vector.load %arg1[%c0_8, %c0_9, %c0_10, %c2] : memref<1x4x16x16xf32, #tpu.memory_space<vmem>>, vector<1x1x13x13xf32>
    %14 = vector.shape_cast %13 : vector<1x1x13x13xf32> to vector<13x13xf32>
    %c2_11 = arith.constant 2 : index
    %15 = memref.load %arg2[%c2_11] : memref<64xf32, #tpu.memory_space<smem>>
    %16 = vector.broadcast %15 : f32 to vector<13x13xf32>
    %17 = arith.mulf %14, %16 : vector<13x13xf32>
    %18 = arith.addf %12, %17 : vector<13x13xf32>
    %c0_12 = arith.constant 0 : index
    %c0_13 = arith.constant 0 : index
    %c0_14 = arith.constant 0 : index
    %c3 = arith.constant 3 : index
    %19 = vector.load %arg1[%c0_12, %c0_13, %c0_14, %c3] : memref<1x4x16x16xf32, #tpu.memory_space<vmem>>, vector<1x1x13x13xf32>
    %20 = vector.shape_cast %19 : vector<1x1x13x13xf32> to vector<13x13xf32>
    %c3_15 = arith.constant 3 : index
    %21 = memref.load %arg2[%c3_15] : memref<64xf32, #tpu.memory_space<smem>>
    %22 = vector.broadcast %21 : f32 to vector<13x13xf32>
    %23 = arith.mulf %20, %22 : vector<13x13xf32>
    %24 = arith.addf %18, %23 : vector<13x13xf32>
    %c0_16 = arith.constant 0 : index
    %c0_17 = arith.constant 0 : index
    %c1_18 = arith.constant 1 : index
    %c0_19 = arith.constant 0 : index
    %25 = vector.load %arg1[%c0_16, %c0_17, %c1_18, %c0_19] : memref<1x4x16x16xf32, #tpu.memory_space<vmem>>, vector<1x1x13x13xf32>
    %26 = vector.shape_cast %25 : vector<1x1x13x13xf32> to vector<13x13xf32>
    %c4 = arith.constant 4 : index
    %27 = memref.load %arg2[%c4] : memref<64xf32, #tpu.memory_space<smem>>
    %28 = vector.broadcast %27 : f32 to vector<13x13xf32>
    %29 = arith.mulf %26, %28 : vector<13x13xf32>
    %30 = arith.addf %24, %29 : vector<13x13xf32>
    %c0_20 = arith.constant 0 : index
    %c0_21 = arith.constant 0 : index
    %c1_22 = arith.constant 1 : index
    %c1_23 = arith.constant 1 : index
    %31 = vector.load %arg1[%c0_20, %c0_21, %c1_22, %c1_23] : memref<1x4x16x16xf32, #tpu.memory_space<vmem>>, vector<1x1x13x13xf32>
    %32 = vector.shape_cast %31 : vector<1x1x13x13xf32> to vector<13x13xf32>
    %c5 = arith.constant 5 : index
    %33 = memref.load %arg2[%c5] : memref<64xf32, #tpu.memory_space<smem>>
    %34 = vector.broadcast %33 : f32 to vector<13x13xf32>
    %35 = arith.mulf %32, %34 : vector<13x13xf32>
    %36 = arith.addf %30, %35 : vector<13x13xf32>
    %c0_24 = arith.constant 0 : index
    %c0_25 = arith.constant 0 : index
    %c1_26 = arith.constant 1 : index
    %c2_27 = arith.constant 2 : index
    %37 = vector.load %arg1[%c0_24, %c0_25, %c1_26, %c2_27] : memref<1x4x16x16xf32, #tpu.memory_space<vmem>>, vector<1x1x13x13xf32>
    %38 = vector.shape_cast %37 : vector<1x1x13x13xf32> to vector<13x13xf32>
    %c6 = arith.constant 6 : index
    %39 = memref.load %arg2[%c6] : memref<64xf32, #tpu.memory_space<smem>>
    %40 = vector.broadcast %39 : f32 to vector<13x13xf32>
    %41 = arith.mulf %38, %40 : vector<13x13xf32>
    %42 = arith.addf %36, %41 : vector<13x13xf32>
    %c0_28 = arith.constant 0 : index
    %c0_29 = arith.constant 0 : index
    %c1_30 = arith.constant 1 : index
    %c3_31 = arith.constant 3 : index
    %43 = vector.load %arg1[%c0_28, %c0_29, %c1_30, %c3_31] : memref<1x4x16x16xf32, #tpu.memory_space<vmem>>, vector<1x1x13x13xf32>
    %44 = vector.shape_cast %43 : vector<1x1x13x13xf32> to vector<13x13xf32>
    %c7 = arith.constant 7 : index
    %45 = memref.load %arg2[%c7] : memref<64xf32, #tpu.memory_space<smem>>
    %46 = vector.broadcast %45 : f32 to vector<13x13xf32>
    %47 = arith.mulf %44, %46 : vector<13x13xf32>
    %48 = arith.addf %42, %47 : vector<13x13xf32>
    %c0_32 = arith.constant 0 : index
    %c0_33 = arith.constant 0 : index
    %c2_34 = arith.constant 2 : index
    %c0_35 = arith.constant 0 : index
    %49 = vector.load %arg1[%c0_32, %c0_33, %c2_34, %c0_35] : memref<1x4x16x16xf32, #tpu.memory_space<vmem>>, vector<1x1x13x13xf32>
    %50 = vector.shape_cast %49 : vector<1x1x13x13xf32> to vector<13x13xf32>
    %c8 = arith.constant 8 : index
    %51 = memref.load %arg2[%c8] : memref<64xf32, #tpu.memory_space<smem>>
    %52 = vector.broadcast %51 : f32 to vector<13x13xf32>
    %53 = arith.mulf %50, %52 : vector<13x13xf32>
    %54 = arith.addf %48, %53 : vector<13x13xf32>
    %c0_36 = arith.constant 0 : index
    %c0_37 = arith.constant 0 : index
    %c2_38 = arith.constant 2 : index
    %c1_39 = arith.constant 1 : index
    %55 = vector.load %arg1[%c0_36, %c0_37, %c2_38, %c1_39] : memref<1x4x16x16xf32, #tpu.memory_space<vmem>>, vector<1x1x13x13xf32>
    %56 = vector.shape_cast %55 : vector<1x1x13x13xf32> to vector<13x13xf32>
    %c9 = arith.constant 9 : index
    %57 = memref.load %arg2[%c9] : memref<64xf32, #tpu.memory_space<smem>>
    %58 = vector.broadcast %57 : f32 to vector<13x13xf32>
    %59 = arith.mulf %56, %58 : vector<13x13xf32>
    %60 = arith.addf %54, %59 : vector<13x13xf32>
    %c0_40 = arith.constant 0 : index
    %c0_41 = arith.constant 0 : index
    %c2_42 = arith.constant 2 : index
    %c2_43 = arith.constant 2 : index
    %61 = vector.load %arg1[%c0_40, %c0_41, %c2_42, %c2_43] : memref<1x4x16x16xf32, #tpu.memory_space<vmem>>, vector<1x1x13x13xf32>
    %62 = vector.shape_cast %61 : vector<1x1x13x13xf32> to vector<13x13xf32>
    %c10 = arith.constant 10 : index
    %63 = memref.load %arg2[%c10] : memref<64xf32, #tpu.memory_space<smem>>
    %64 = vector.broadcast %63 : f32 to vector<13x13xf32>
    %65 = arith.mulf %62, %64 : vector<13x13xf32>
    %66 = arith.addf %60, %65 : vector<13x13xf32>
    %c0_44 = arith.constant 0 : index
    %c0_45 = arith.constant 0 : index
    %c2_46 = arith.constant 2 : index
    %c3_47 = arith.constant 3 : index
    %67 = vector.load %arg1[%c0_44, %c0_45, %c2_46, %c3_47] : memref<1x4x16x16xf32, #tpu.memory_space<vmem>>, vector<1x1x13x13xf32>
    %68 = vector.shape_cast %67 : vector<1x1x13x13xf32> to vector<13x13xf32>
    %c11 = arith.constant 11 : index
    %69 = memref.load %arg2[%c11] : memref<64xf32, #tpu.memory_space<smem>>
    %70 = vector.broadcast %69 : f32 to vector<13x13xf32>
    %71 = arith.mulf %68, %70 : vector<13x13xf32>
    %72 = arith.addf %66, %71 : vector<13x13xf32>
    %c0_48 = arith.constant 0 : index
    %c0_49 = arith.constant 0 : index
    %c3_50 = arith.constant 3 : index
    %c0_51 = arith.constant 0 : index
    %73 = vector.load %arg1[%c0_48, %c0_49, %c3_50, %c0_51] : memref<1x4x16x16xf32, #tpu.memory_space<vmem>>, vector<1x1x13x13xf32>
    %74 = vector.shape_cast %73 : vector<1x1x13x13xf32> to vector<13x13xf32>
    %c12 = arith.constant 12 : index
    %75 = memref.load %arg2[%c12] : memref<64xf32, #tpu.memory_space<smem>>
    %76 = vector.broadcast %75 : f32 to vector<13x13xf32>
    %77 = arith.mulf %74, %76 : vector<13x13xf32>
    %78 = arith.addf %72, %77 : vector<13x13xf32>
    %c0_52 = arith.constant 0 : index
    %c0_53 = arith.constant 0 : index
    %c3_54 = arith.constant 3 : index
    %c1_55 = arith.constant 1 : index
    %79 = vector.load %arg1[%c0_52, %c0_53, %c3_54, %c1_55] : memref<1x4x16x16xf32, #tpu.memory_space<vmem>>, vector<1x1x13x13xf32>
    %80 = vector.shape_cast %79 : vector<1x1x13x13xf32> to vector<13x13xf32>
    %c13 = arith.constant 13 : index
    %81 = memref.load %arg2[%c13] : memref<64xf32, #tpu.memory_space<smem>>
    %82 = vector.broadcast %81 : f32 to vector<13x13xf32>
    %83 = arith.mulf %80, %82 : vector<13x13xf32>
    %84 = arith.addf %78, %83 : vector<13x13xf32>
    %c0_56 = arith.constant 0 : index
    %c0_57 = arith.constant 0 : index
    %c3_58 = arith.constant 3 : index
    %c2_59 = arith.constant 2 : index
    %85 = vector.load %arg1[%c0_56, %c0_57, %c3_58, %c2_59] : memref<1x4x16x16xf32, #tpu.memory_space<vmem>>, vector<1x1x13x13xf32>
    %86 = vector.shape_cast %85 : vector<1x1x13x13xf32> to vector<13x13xf32>
    %c14 = arith.constant 14 : index
    %87 = memref.load %arg2[%c14] : memref<64xf32, #tpu.memory_space<smem>>
    %88 = vector.broadcast %87 : f32 to vector<13x13xf32>
    %89 = arith.mulf %86, %88 : vector<13x13xf32>
    %90 = arith.addf %84, %89 : vector<13x13xf32>
    %c0_60 = arith.constant 0 : index
    %c0_61 = arith.constant 0 : index
    %c3_62 = arith.constant 3 : index
    %c3_63 = arith.constant 3 : index
    %91 = vector.load %arg1[%c0_60, %c0_61, %c3_62, %c3_63] : memref<1x4x16x16xf32, #tpu.memory_space<vmem>>, vector<1x1x13x13xf32>
    %92 = vector.shape_cast %91 : vector<1x1x13x13xf32> to vector<13x13xf32>
    %c15 = arith.constant 15 : index
    %93 = memref.load %arg2[%c15] : memref<64xf32, #tpu.memory_space<smem>>
    %94 = vector.broadcast %93 : f32 to vector<13x13xf32>
    %95 = arith.mulf %92, %94 : vector<13x13xf32>
    %96 = arith.addf %90, %95 : vector<13x13xf32>
    %c0_64 = arith.constant 0 : index
    %c1_65 = arith.constant 1 : index
    %c0_66 = arith.constant 0 : index
    %c0_67 = arith.constant 0 : index
    %97 = vector.load %arg1[%c0_64, %c1_65, %c0_66, %c0_67] : memref<1x4x16x16xf32, #tpu.memory_space<vmem>>, vector<1x1x13x13xf32>
    %98 = vector.shape_cast %97 : vector<1x1x13x13xf32> to vector<13x13xf32>
    %c16 = arith.constant 16 : index
    %99 = memref.load %arg2[%c16] : memref<64xf32, #tpu.memory_space<smem>>
    %100 = vector.broadcast %99 : f32 to vector<13x13xf32>
    %101 = arith.mulf %98, %100 : vector<13x13xf32>
    %102 = arith.addf %96, %101 : vector<13x13xf32>
    %c0_68 = arith.constant 0 : index
    %c1_69 = arith.constant 1 : index
    %c0_70 = arith.constant 0 : index
    %c1_71 = arith.constant 1 : index
    %103 = vector.load %arg1[%c0_68, %c1_69, %c0_70, %c1_71] : memref<1x4x16x16xf32, #tpu.memory_space<vmem>>, vector<1x1x13x13xf32>
    %104 = vector.shape_cast %103 : vector<1x1x13x13xf32> to vector<13x13xf32>
    %c17 = arith.constant 17 : index
    %105 = memref.load %arg2[%c17] : memref<64xf32, #tpu.memory_space<smem>>
    %106 = vector.broadcast %105 : f32 to vector<13x13xf32>
    %107 = arith.mulf %104, %106 : vector<13x13xf32>
    %108 = arith.addf %102, %107 : vector<13x13xf32>
    %c0_72 = arith.constant 0 : index
    %c1_73 = arith.constant 1 : index
    %c0_74 = arith.constant 0 : index
    %c2_75 = arith.constant 2 : index
    %109 = vector.load %arg1[%c0_72, %c1_73, %c0_74, %c2_75] : memref<1x4x16x16xf32, #tpu.memory_space<vmem>>, vector<1x1x13x13xf32>
    %110 = vector.shape_cast %109 : vector<1x1x13x13xf32> to vector<13x13xf32>
    %c18 = arith.constant 18 : index
    %111 = memref.load %arg2[%c18] : memref<64xf32, #tpu.memory_space<smem>>
    %112 = vector.broadcast %111 : f32 to vector<13x13xf32>
    %113 = arith.mulf %110, %112 : vector<13x13xf32>
    %114 = arith.addf %108, %113 : vector<13x13xf32>
    %c0_76 = arith.constant 0 : index
    %c1_77 = arith.constant 1 : index
    %c0_78 = arith.constant 0 : index
    %c3_79 = arith.constant 3 : index
    %115 = vector.load %arg1[%c0_76, %c1_77, %c0_78, %c3_79] : memref<1x4x16x16xf32, #tpu.memory_space<vmem>>, vector<1x1x13x13xf32>
    %116 = vector.shape_cast %115 : vector<1x1x13x13xf32> to vector<13x13xf32>
    %c19 = arith.constant 19 : index
    %117 = memref.load %arg2[%c19] : memref<64xf32, #tpu.memory_space<smem>>
    %118 = vector.broadcast %117 : f32 to vector<13x13xf32>
    %119 = arith.mulf %116, %118 : vector<13x13xf32>
    %120 = arith.addf %114, %119 : vector<13x13xf32>
    %c0_80 = arith.constant 0 : index
    %c1_81 = arith.constant 1 : index
    %c1_82 = arith.constant 1 : index
    %c0_83 = arith.constant 0 : index
    %121 = vector.load %arg1[%c0_80, %c1_81, %c1_82, %c0_83] : memref<1x4x16x16xf32, #tpu.memory_space<vmem>>, vector<1x1x13x13xf32>
    %122 = vector.shape_cast %121 : vector<1x1x13x13xf32> to vector<13x13xf32>
    %c20 = arith.constant 20 : index
    %123 = memref.load %arg2[%c20] : memref<64xf32, #tpu.memory_space<smem>>
    %124 = vector.broadcast %123 : f32 to vector<13x13xf32>
    %125 = arith.mulf %122, %124 : vector<13x13xf32>
    %126 = arith.addf %120, %125 : vector<13x13xf32>
    %c0_84 = arith.constant 0 : index
    %c1_85 = arith.constant 1 : index
    %c1_86 = arith.constant 1 : index
    %c1_87 = arith.constant 1 : index
    %127 = vector.load %arg1[%c0_84, %c1_85, %c1_86, %c1_87] : memref<1x4x16x16xf32, #tpu.memory_space<vmem>>, vector<1x1x13x13xf32>
    %128 = vector.shape_cast %127 : vector<1x1x13x13xf32> to vector<13x13xf32>
    %c21 = arith.constant 21 : index
    %129 = memref.load %arg2[%c21] : memref<64xf32, #tpu.memory_space<smem>>
    %130 = vector.broadcast %129 : f32 to vector<13x13xf32>
    %131 = arith.mulf %128, %130 : vector<13x13xf32>
    %132 = arith.addf %126, %131 : vector<13x13xf32>
    %c0_88 = arith.constant 0 : index
    %c1_89 = arith.constant 1 : index
    %c1_90 = arith.constant 1 : index
    %c2_91 = arith.constant 2 : index
    %133 = vector.load %arg1[%c0_88, %c1_89, %c1_90, %c2_91] : memref<1x4x16x16xf32, #tpu.memory_space<vmem>>, vector<1x1x13x13xf32>
    %134 = vector.shape_cast %133 : vector<1x1x13x13xf32> to vector<13x13xf32>
    %c22 = arith.constant 22 : index
    %135 = memref.load %arg2[%c22] : memref<64xf32, #tpu.memory_space<smem>>
    %136 = vector.broadcast %135 : f32 to vector<13x13xf32>
    %137 = arith.mulf %134, %136 : vector<13x13xf32>
    %138 = arith.addf %132, %137 : vector<13x13xf32>
    %c0_92 = arith.constant 0 : index
    %c1_93 = arith.constant 1 : index
    %c1_94 = arith.constant 1 : index
    %c3_95 = arith.constant 3 : index
    %139 = vector.load %arg1[%c0_92, %c1_93, %c1_94, %c3_95] : memref<1x4x16x16xf32, #tpu.memory_space<vmem>>, vector<1x1x13x13xf32>
    %140 = vector.shape_cast %139 : vector<1x1x13x13xf32> to vector<13x13xf32>
    %c23 = arith.constant 23 : index
    %141 = memref.load %arg2[%c23] : memref<64xf32, #tpu.memory_space<smem>>
    %142 = vector.broadcast %141 : f32 to vector<13x13xf32>
    %143 = arith.mulf %140, %142 : vector<13x13xf32>
    %144 = arith.addf %138, %143 : vector<13x13xf32>
    %c0_96 = arith.constant 0 : index
    %c1_97 = arith.constant 1 : index
    %c2_98 = arith.constant 2 : index
    %c0_99 = arith.constant 0 : index
    %145 = vector.load %arg1[%c0_96, %c1_97, %c2_98, %c0_99] : memref<1x4x16x16xf32, #tpu.memory_space<vmem>>, vector<1x1x13x13xf32>
    %146 = vector.shape_cast %145 : vector<1x1x13x13xf32> to vector<13x13xf32>
    %c24 = arith.constant 24 : index
    %147 = memref.load %arg2[%c24] : memref<64xf32, #tpu.memory_space<smem>>
    %148 = vector.broadcast %147 : f32 to vector<13x13xf32>
    %149 = arith.mulf %146, %148 : vector<13x13xf32>
    %150 = arith.addf %144, %149 : vector<13x13xf32>
    %c0_100 = arith.constant 0 : index
    %c1_101 = arith.constant 1 : index
    %c2_102 = arith.constant 2 : index
    %c1_103 = arith.constant 1 : index
    %151 = vector.load %arg1[%c0_100, %c1_101, %c2_102, %c1_103] : memref<1x4x16x16xf32, #tpu.memory_space<vmem>>, vector<1x1x13x13xf32>
    %152 = vector.shape_cast %151 : vector<1x1x13x13xf32> to vector<13x13xf32>
    %c25 = arith.constant 25 : index
    %153 = memref.load %arg2[%c25] : memref<64xf32, #tpu.memory_space<smem>>
    %154 = vector.broadcast %153 : f32 to vector<13x13xf32>
    %155 = arith.mulf %152, %154 : vector<13x13xf32>
    %156 = arith.addf %150, %155 : vector<13x13xf32>
    %c0_104 = arith.constant 0 : index
    %c1_105 = arith.constant 1 : index
    %c2_106 = arith.constant 2 : index
    %c2_107 = arith.constant 2 : index
    %157 = vector.load %arg1[%c0_104, %c1_105, %c2_106, %c2_107] : memref<1x4x16x16xf32, #tpu.memory_space<vmem>>, vector<1x1x13x13xf32>
    %158 = vector.shape_cast %157 : vector<1x1x13x13xf32> to vector<13x13xf32>
    %c26 = arith.constant 26 : index
    %159 = memref.load %arg2[%c26] : memref<64xf32, #tpu.memory_space<smem>>
    %160 = vector.broadcast %159 : f32 to vector<13x13xf32>
    %161 = arith.mulf %158, %160 : vector<13x13xf32>
    %162 = arith.addf %156, %161 : vector<13x13xf32>
    %c0_108 = arith.constant 0 : index
    %c1_109 = arith.constant 1 : index
    %c2_110 = arith.constant 2 : index
    %c3_111 = arith.constant 3 : index
    %163 = vector.load %arg1[%c0_108, %c1_109, %c2_110, %c3_111] : memref<1x4x16x16xf32, #tpu.memory_space<vmem>>, vector<1x1x13x13xf32>
    %164 = vector.shape_cast %163 : vector<1x1x13x13xf32> to vector<13x13xf32>
    %c27 = arith.constant 27 : index
    %165 = memref.load %arg2[%c27] : memref<64xf32, #tpu.memory_space<smem>>
    %166 = vector.broadcast %165 : f32 to vector<13x13xf32>
    %167 = arith.mulf %164, %166 : vector<13x13xf32>
    %168 = arith.addf %162, %167 : vector<13x13xf32>
    %c0_112 = arith.constant 0 : index
    %c1_113 = arith.constant 1 : index
    %c3_114 = arith.constant 3 : index
    %c0_115 = arith.constant 0 : index
    %169 = vector.load %arg1[%c0_112, %c1_113, %c3_114, %c0_115] : memref<1x4x16x16xf32, #tpu.memory_space<vmem>>, vector<1x1x13x13xf32>
    %170 = vector.shape_cast %169 : vector<1x1x13x13xf32> to vector<13x13xf32>
    %c28 = arith.constant 28 : index
    %171 = memref.load %arg2[%c28] : memref<64xf32, #tpu.memory_space<smem>>
    %172 = vector.broadcast %171 : f32 to vector<13x13xf32>
    %173 = arith.mulf %170, %172 : vector<13x13xf32>
    %174 = arith.addf %168, %173 : vector<13x13xf32>
    %c0_116 = arith.constant 0 : index
    %c1_117 = arith.constant 1 : index
    %c3_118 = arith.constant 3 : index
    %c1_119 = arith.constant 1 : index
    %175 = vector.load %arg1[%c0_116, %c1_117, %c3_118, %c1_119] : memref<1x4x16x16xf32, #tpu.memory_space<vmem>>, vector<1x1x13x13xf32>
    %176 = vector.shape_cast %175 : vector<1x1x13x13xf32> to vector<13x13xf32>
    %c29 = arith.constant 29 : index
    %177 = memref.load %arg2[%c29] : memref<64xf32, #tpu.memory_space<smem>>
    %178 = vector.broadcast %177 : f32 to vector<13x13xf32>
    %179 = arith.mulf %176, %178 : vector<13x13xf32>
    %180 = arith.addf %174, %179 : vector<13x13xf32>
    %c0_120 = arith.constant 0 : index
    %c1_121 = arith.constant 1 : index
    %c3_122 = arith.constant 3 : index
    %c2_123 = arith.constant 2 : index
    %181 = vector.load %arg1[%c0_120, %c1_121, %c3_122, %c2_123] : memref<1x4x16x16xf32, #tpu.memory_space<vmem>>, vector<1x1x13x13xf32>
    %182 = vector.shape_cast %181 : vector<1x1x13x13xf32> to vector<13x13xf32>
    %c30 = arith.constant 30 : index
    %183 = memref.load %arg2[%c30] : memref<64xf32, #tpu.memory_space<smem>>
    %184 = vector.broadcast %183 : f32 to vector<13x13xf32>
    %185 = arith.mulf %182, %184 : vector<13x13xf32>
    %186 = arith.addf %180, %185 : vector<13x13xf32>
    %c0_124 = arith.constant 0 : index
    %c1_125 = arith.constant 1 : index
    %c3_126 = arith.constant 3 : index
    %c3_127 = arith.constant 3 : index
    %187 = vector.load %arg1[%c0_124, %c1_125, %c3_126, %c3_127] : memref<1x4x16x16xf32, #tpu.memory_space<vmem>>, vector<1x1x13x13xf32>
    %188 = vector.shape_cast %187 : vector<1x1x13x13xf32> to vector<13x13xf32>
    %c31 = arith.constant 31 : index
    %189 = memref.load %arg2[%c31] : memref<64xf32, #tpu.memory_space<smem>>
    %190 = vector.broadcast %189 : f32 to vector<13x13xf32>
    %191 = arith.mulf %188, %190 : vector<13x13xf32>
    %192 = arith.addf %186, %191 : vector<13x13xf32>
    %c0_128 = arith.constant 0 : index
    %c2_129 = arith.constant 2 : index
    %c0_130 = arith.constant 0 : index
    %c0_131 = arith.constant 0 : index
    %193 = vector.load %arg1[%c0_128, %c2_129, %c0_130, %c0_131] : memref<1x4x16x16xf32, #tpu.memory_space<vmem>>, vector<1x1x13x13xf32>
    %194 = vector.shape_cast %193 : vector<1x1x13x13xf32> to vector<13x13xf32>
    %c32 = arith.constant 32 : index
    %195 = memref.load %arg2[%c32] : memref<64xf32, #tpu.memory_space<smem>>
    %196 = vector.broadcast %195 : f32 to vector<13x13xf32>
    %197 = arith.mulf %194, %196 : vector<13x13xf32>
    %198 = arith.addf %192, %197 : vector<13x13xf32>
    %c0_132 = arith.constant 0 : index
    %c2_133 = arith.constant 2 : index
    %c0_134 = arith.constant 0 : index
    %c1_135 = arith.constant 1 : index
    %199 = vector.load %arg1[%c0_132, %c2_133, %c0_134, %c1_135] : memref<1x4x16x16xf32, #tpu.memory_space<vmem>>, vector<1x1x13x13xf32>
    %200 = vector.shape_cast %199 : vector<1x1x13x13xf32> to vector<13x13xf32>
    %c33 = arith.constant 33 : index
    %201 = memref.load %arg2[%c33] : memref<64xf32, #tpu.memory_space<smem>>
    %202 = vector.broadcast %201 : f32 to vector<13x13xf32>
    %203 = arith.mulf %200, %202 : vector<13x13xf32>
    %204 = arith.addf %198, %203 : vector<13x13xf32>
    %c0_136 = arith.constant 0 : index
    %c2_137 = arith.constant 2 : index
    %c0_138 = arith.constant 0 : index
    %c2_139 = arith.constant 2 : index
    %205 = vector.load %arg1[%c0_136, %c2_137, %c0_138, %c2_139] : memref<1x4x16x16xf32, #tpu.memory_space<vmem>>, vector<1x1x13x13xf32>
    %206 = vector.shape_cast %205 : vector<1x1x13x13xf32> to vector<13x13xf32>
    %c34 = arith.constant 34 : index
    %207 = memref.load %arg2[%c34] : memref<64xf32, #tpu.memory_space<smem>>
    %208 = vector.broadcast %207 : f32 to vector<13x13xf32>
    %209 = arith.mulf %206, %208 : vector<13x13xf32>
    %210 = arith.addf %204, %209 : vector<13x13xf32>
    %c0_140 = arith.constant 0 : index
    %c2_141 = arith.constant 2 : index
    %c0_142 = arith.constant 0 : index
    %c3_143 = arith.constant 3 : index
    %211 = vector.load %arg1[%c0_140, %c2_141, %c0_142, %c3_143] : memref<1x4x16x16xf32, #tpu.memory_space<vmem>>, vector<1x1x13x13xf32>
    %212 = vector.shape_cast %211 : vector<1x1x13x13xf32> to vector<13x13xf32>
    %c35 = arith.constant 35 : index
    %213 = memref.load %arg2[%c35] : memref<64xf32, #tpu.memory_space<smem>>
    %214 = vector.broadcast %213 : f32 to vector<13x13xf32>
    %215 = arith.mulf %212, %214 : vector<13x13xf32>
    %216 = arith.addf %210, %215 : vector<13x13xf32>
    %c0_144 = arith.constant 0 : index
    %c2_145 = arith.constant 2 : index
    %c1_146 = arith.constant 1 : index
    %c0_147 = arith.constant 0 : index
    %217 = vector.load %arg1[%c0_144, %c2_145, %c1_146, %c0_147] : memref<1x4x16x16xf32, #tpu.memory_space<vmem>>, vector<1x1x13x13xf32>
    %218 = vector.shape_cast %217 : vector<1x1x13x13xf32> to vector<13x13xf32>
    %c36 = arith.constant 36 : index
    %219 = memref.load %arg2[%c36] : memref<64xf32, #tpu.memory_space<smem>>
    %220 = vector.broadcast %219 : f32 to vector<13x13xf32>
    %221 = arith.mulf %218, %220 : vector<13x13xf32>
    %222 = arith.addf %216, %221 : vector<13x13xf32>
    %c0_148 = arith.constant 0 : index
    %c2_149 = arith.constant 2 : index
    %c1_150 = arith.constant 1 : index
    %c1_151 = arith.constant 1 : index
    %223 = vector.load %arg1[%c0_148, %c2_149, %c1_150, %c1_151] : memref<1x4x16x16xf32, #tpu.memory_space<vmem>>, vector<1x1x13x13xf32>
    %224 = vector.shape_cast %223 : vector<1x1x13x13xf32> to vector<13x13xf32>
    %c37 = arith.constant 37 : index
    %225 = memref.load %arg2[%c37] : memref<64xf32, #tpu.memory_space<smem>>
    %226 = vector.broadcast %225 : f32 to vector<13x13xf32>
    %227 = arith.mulf %224, %226 : vector<13x13xf32>
    %228 = arith.addf %222, %227 : vector<13x13xf32>
    %c0_152 = arith.constant 0 : index
    %c2_153 = arith.constant 2 : index
    %c1_154 = arith.constant 1 : index
    %c2_155 = arith.constant 2 : index
    %229 = vector.load %arg1[%c0_152, %c2_153, %c1_154, %c2_155] : memref<1x4x16x16xf32, #tpu.memory_space<vmem>>, vector<1x1x13x13xf32>
    %230 = vector.shape_cast %229 : vector<1x1x13x13xf32> to vector<13x13xf32>
    %c38 = arith.constant 38 : index
    %231 = memref.load %arg2[%c38] : memref<64xf32, #tpu.memory_space<smem>>
    %232 = vector.broadcast %231 : f32 to vector<13x13xf32>
    %233 = arith.mulf %230, %232 : vector<13x13xf32>
    %234 = arith.addf %228, %233 : vector<13x13xf32>
    %c0_156 = arith.constant 0 : index
    %c2_157 = arith.constant 2 : index
    %c1_158 = arith.constant 1 : index
    %c3_159 = arith.constant 3 : index
    %235 = vector.load %arg1[%c0_156, %c2_157, %c1_158, %c3_159] : memref<1x4x16x16xf32, #tpu.memory_space<vmem>>, vector<1x1x13x13xf32>
    %236 = vector.shape_cast %235 : vector<1x1x13x13xf32> to vector<13x13xf32>
    %c39 = arith.constant 39 : index
    %237 = memref.load %arg2[%c39] : memref<64xf32, #tpu.memory_space<smem>>
    %238 = vector.broadcast %237 : f32 to vector<13x13xf32>
    %239 = arith.mulf %236, %238 : vector<13x13xf32>
    %240 = arith.addf %234, %239 : vector<13x13xf32>
    %c0_160 = arith.constant 0 : index
    %c2_161 = arith.constant 2 : index
    %c2_162 = arith.constant 2 : index
    %c0_163 = arith.constant 0 : index
    %241 = vector.load %arg1[%c0_160, %c2_161, %c2_162, %c0_163] : memref<1x4x16x16xf32, #tpu.memory_space<vmem>>, vector<1x1x13x13xf32>
    %242 = vector.shape_cast %241 : vector<1x1x13x13xf32> to vector<13x13xf32>
    %c40 = arith.constant 40 : index
    %243 = memref.load %arg2[%c40] : memref<64xf32, #tpu.memory_space<smem>>
    %244 = vector.broadcast %243 : f32 to vector<13x13xf32>
    %245 = arith.mulf %242, %244 : vector<13x13xf32>
    %246 = arith.addf %240, %245 : vector<13x13xf32>
    %c0_164 = arith.constant 0 : index
    %c2_165 = arith.constant 2 : index
    %c2_166 = arith.constant 2 : index
    %c1_167 = arith.constant 1 : index
    %247 = vector.load %arg1[%c0_164, %c2_165, %c2_166, %c1_167] : memref<1x4x16x16xf32, #tpu.memory_space<vmem>>, vector<1x1x13x13xf32>
    %248 = vector.shape_cast %247 : vector<1x1x13x13xf32> to vector<13x13xf32>
    %c41 = arith.constant 41 : index
    %249 = memref.load %arg2[%c41] : memref<64xf32, #tpu.memory_space<smem>>
    %250 = vector.broadcast %249 : f32 to vector<13x13xf32>
    %251 = arith.mulf %248, %250 : vector<13x13xf32>
    %252 = arith.addf %246, %251 : vector<13x13xf32>
    %c0_168 = arith.constant 0 : index
    %c2_169 = arith.constant 2 : index
    %c2_170 = arith.constant 2 : index
    %c2_171 = arith.constant 2 : index
    %253 = vector.load %arg1[%c0_168, %c2_169, %c2_170, %c2_171] : memref<1x4x16x16xf32, #tpu.memory_space<vmem>>, vector<1x1x13x13xf32>
    %254 = vector.shape_cast %253 : vector<1x1x13x13xf32> to vector<13x13xf32>
    %c42 = arith.constant 42 : index
    %255 = memref.load %arg2[%c42] : memref<64xf32, #tpu.memory_space<smem>>
    %256 = vector.broadcast %255 : f32 to vector<13x13xf32>
    %257 = arith.mulf %254, %256 : vector<13x13xf32>
    %258 = arith.addf %252, %257 : vector<13x13xf32>
    %c0_172 = arith.constant 0 : index
    %c2_173 = arith.constant 2 : index
    %c2_174 = arith.constant 2 : index
    %c3_175 = arith.constant 3 : index
    %259 = vector.load %arg1[%c0_172, %c2_173, %c2_174, %c3_175] : memref<1x4x16x16xf32, #tpu.memory_space<vmem>>, vector<1x1x13x13xf32>
    %260 = vector.shape_cast %259 : vector<1x1x13x13xf32> to vector<13x13xf32>
    %c43 = arith.constant 43 : index
    %261 = memref.load %arg2[%c43] : memref<64xf32, #tpu.memory_space<smem>>
    %262 = vector.broadcast %261 : f32 to vector<13x13xf32>
    %263 = arith.mulf %260, %262 : vector<13x13xf32>
    %264 = arith.addf %258, %263 : vector<13x13xf32>
    %c0_176 = arith.constant 0 : index
    %c2_177 = arith.constant 2 : index
    %c3_178 = arith.constant 3 : index
    %c0_179 = arith.constant 0 : index
    %265 = vector.load %arg1[%c0_176, %c2_177, %c3_178, %c0_179] : memref<1x4x16x16xf32, #tpu.memory_space<vmem>>, vector<1x1x13x13xf32>
    %266 = vector.shape_cast %265 : vector<1x1x13x13xf32> to vector<13x13xf32>
    %c44 = arith.constant 44 : index
    %267 = memref.load %arg2[%c44] : memref<64xf32, #tpu.memory_space<smem>>
    %268 = vector.broadcast %267 : f32 to vector<13x13xf32>
    %269 = arith.mulf %266, %268 : vector<13x13xf32>
    %270 = arith.addf %264, %269 : vector<13x13xf32>
    %c0_180 = arith.constant 0 : index
    %c2_181 = arith.constant 2 : index
    %c3_182 = arith.constant 3 : index
    %c1_183 = arith.constant 1 : index
    %271 = vector.load %arg1[%c0_180, %c2_181, %c3_182, %c1_183] : memref<1x4x16x16xf32, #tpu.memory_space<vmem>>, vector<1x1x13x13xf32>
    %272 = vector.shape_cast %271 : vector<1x1x13x13xf32> to vector<13x13xf32>
    %c45 = arith.constant 45 : index
    %273 = memref.load %arg2[%c45] : memref<64xf32, #tpu.memory_space<smem>>
    %274 = vector.broadcast %273 : f32 to vector<13x13xf32>
    %275 = arith.mulf %272, %274 : vector<13x13xf32>
    %276 = arith.addf %270, %275 : vector<13x13xf32>
    %c0_184 = arith.constant 0 : index
    %c2_185 = arith.constant 2 : index
    %c3_186 = arith.constant 3 : index
    %c2_187 = arith.constant 2 : index
    %277 = vector.load %arg1[%c0_184, %c2_185, %c3_186, %c2_187] : memref<1x4x16x16xf32, #tpu.memory_space<vmem>>, vector<1x1x13x13xf32>
    %278 = vector.shape_cast %277 : vector<1x1x13x13xf32> to vector<13x13xf32>
    %c46 = arith.constant 46 : index
    %279 = memref.load %arg2[%c46] : memref<64xf32, #tpu.memory_space<smem>>
    %280 = vector.broadcast %279 : f32 to vector<13x13xf32>
    %281 = arith.mulf %278, %280 : vector<13x13xf32>
    %282 = arith.addf %276, %281 : vector<13x13xf32>
    %c0_188 = arith.constant 0 : index
    %c2_189 = arith.constant 2 : index
    %c3_190 = arith.constant 3 : index
    %c3_191 = arith.constant 3 : index
    %283 = vector.load %arg1[%c0_188, %c2_189, %c3_190, %c3_191] : memref<1x4x16x16xf32, #tpu.memory_space<vmem>>, vector<1x1x13x13xf32>
    %284 = vector.shape_cast %283 : vector<1x1x13x13xf32> to vector<13x13xf32>
    %c47 = arith.constant 47 : index
    %285 = memref.load %arg2[%c47] : memref<64xf32, #tpu.memory_space<smem>>
    %286 = vector.broadcast %285 : f32 to vector<13x13xf32>
    %287 = arith.mulf %284, %286 : vector<13x13xf32>
    %288 = arith.addf %282, %287 : vector<13x13xf32>
    %c0_192 = arith.constant 0 : index
    %c3_193 = arith.constant 3 : index
    %c0_194 = arith.constant 0 : index
    %c0_195 = arith.constant 0 : index
    %289 = vector.load %arg1[%c0_192, %c3_193, %c0_194, %c0_195] : memref<1x4x16x16xf32, #tpu.memory_space<vmem>>, vector<1x1x13x13xf32>
    %290 = vector.shape_cast %289 : vector<1x1x13x13xf32> to vector<13x13xf32>
    %c48 = arith.constant 48 : index
    %291 = memref.load %arg2[%c48] : memref<64xf32, #tpu.memory_space<smem>>
    %292 = vector.broadcast %291 : f32 to vector<13x13xf32>
    %293 = arith.mulf %290, %292 : vector<13x13xf32>
    %294 = arith.addf %288, %293 : vector<13x13xf32>
    %c0_196 = arith.constant 0 : index
    %c3_197 = arith.constant 3 : index
    %c0_198 = arith.constant 0 : index
    %c1_199 = arith.constant 1 : index
    %295 = vector.load %arg1[%c0_196, %c3_197, %c0_198, %c1_199] : memref<1x4x16x16xf32, #tpu.memory_space<vmem>>, vector<1x1x13x13xf32>
    %296 = vector.shape_cast %295 : vector<1x1x13x13xf32> to vector<13x13xf32>
    %c49 = arith.constant 49 : index
    %297 = memref.load %arg2[%c49] : memref<64xf32, #tpu.memory_space<smem>>
    %298 = vector.broadcast %297 : f32 to vector<13x13xf32>
    %299 = arith.mulf %296, %298 : vector<13x13xf32>
    %300 = arith.addf %294, %299 : vector<13x13xf32>
    %c0_200 = arith.constant 0 : index
    %c3_201 = arith.constant 3 : index
    %c0_202 = arith.constant 0 : index
    %c2_203 = arith.constant 2 : index
    %301 = vector.load %arg1[%c0_200, %c3_201, %c0_202, %c2_203] : memref<1x4x16x16xf32, #tpu.memory_space<vmem>>, vector<1x1x13x13xf32>
    %302 = vector.shape_cast %301 : vector<1x1x13x13xf32> to vector<13x13xf32>
    %c50 = arith.constant 50 : index
    %303 = memref.load %arg2[%c50] : memref<64xf32, #tpu.memory_space<smem>>
    %304 = vector.broadcast %303 : f32 to vector<13x13xf32>
    %305 = arith.mulf %302, %304 : vector<13x13xf32>
    %306 = arith.addf %300, %305 : vector<13x13xf32>
    %c0_204 = arith.constant 0 : index
    %c3_205 = arith.constant 3 : index
    %c0_206 = arith.constant 0 : index
    %c3_207 = arith.constant 3 : index
    %307 = vector.load %arg1[%c0_204, %c3_205, %c0_206, %c3_207] : memref<1x4x16x16xf32, #tpu.memory_space<vmem>>, vector<1x1x13x13xf32>
    %308 = vector.shape_cast %307 : vector<1x1x13x13xf32> to vector<13x13xf32>
    %c51 = arith.constant 51 : index
    %309 = memref.load %arg2[%c51] : memref<64xf32, #tpu.memory_space<smem>>
    %310 = vector.broadcast %309 : f32 to vector<13x13xf32>
    %311 = arith.mulf %308, %310 : vector<13x13xf32>
    %312 = arith.addf %306, %311 : vector<13x13xf32>
    %c0_208 = arith.constant 0 : index
    %c3_209 = arith.constant 3 : index
    %c1_210 = arith.constant 1 : index
    %c0_211 = arith.constant 0 : index
    %313 = vector.load %arg1[%c0_208, %c3_209, %c1_210, %c0_211] : memref<1x4x16x16xf32, #tpu.memory_space<vmem>>, vector<1x1x13x13xf32>
    %314 = vector.shape_cast %313 : vector<1x1x13x13xf32> to vector<13x13xf32>
    %c52 = arith.constant 52 : index
    %315 = memref.load %arg2[%c52] : memref<64xf32, #tpu.memory_space<smem>>
    %316 = vector.broadcast %315 : f32 to vector<13x13xf32>
    %317 = arith.mulf %314, %316 : vector<13x13xf32>
    %318 = arith.addf %312, %317 : vector<13x13xf32>
    %c0_212 = arith.constant 0 : index
    %c3_213 = arith.constant 3 : index
    %c1_214 = arith.constant 1 : index
    %c1_215 = arith.constant 1 : index
    %319 = vector.load %arg1[%c0_212, %c3_213, %c1_214, %c1_215] : memref<1x4x16x16xf32, #tpu.memory_space<vmem>>, vector<1x1x13x13xf32>
    %320 = vector.shape_cast %319 : vector<1x1x13x13xf32> to vector<13x13xf32>
    %c53 = arith.constant 53 : index
    %321 = memref.load %arg2[%c53] : memref<64xf32, #tpu.memory_space<smem>>
    %322 = vector.broadcast %321 : f32 to vector<13x13xf32>
    %323 = arith.mulf %320, %322 : vector<13x13xf32>
    %324 = arith.addf %318, %323 : vector<13x13xf32>
    %c0_216 = arith.constant 0 : index
    %c3_217 = arith.constant 3 : index
    %c1_218 = arith.constant 1 : index
    %c2_219 = arith.constant 2 : index
    %325 = vector.load %arg1[%c0_216, %c3_217, %c1_218, %c2_219] : memref<1x4x16x16xf32, #tpu.memory_space<vmem>>, vector<1x1x13x13xf32>
    %326 = vector.shape_cast %325 : vector<1x1x13x13xf32> to vector<13x13xf32>
    %c54 = arith.constant 54 : index
    %327 = memref.load %arg2[%c54] : memref<64xf32, #tpu.memory_space<smem>>
    %328 = vector.broadcast %327 : f32 to vector<13x13xf32>
    %329 = arith.mulf %326, %328 : vector<13x13xf32>
    %330 = arith.addf %324, %329 : vector<13x13xf32>
    %c0_220 = arith.constant 0 : index
    %c3_221 = arith.constant 3 : index
    %c1_222 = arith.constant 1 : index
    %c3_223 = arith.constant 3 : index
    %331 = vector.load %arg1[%c0_220, %c3_221, %c1_222, %c3_223] : memref<1x4x16x16xf32, #tpu.memory_space<vmem>>, vector<1x1x13x13xf32>
    %332 = vector.shape_cast %331 : vector<1x1x13x13xf32> to vector<13x13xf32>
    %c55 = arith.constant 55 : index
    %333 = memref.load %arg2[%c55] : memref<64xf32, #tpu.memory_space<smem>>
    %334 = vector.broadcast %333 : f32 to vector<13x13xf32>
    %335 = arith.mulf %332, %334 : vector<13x13xf32>
    %336 = arith.addf %330, %335 : vector<13x13xf32>
    %c0_224 = arith.constant 0 : index
    %c3_225 = arith.constant 3 : index
    %c2_226 = arith.constant 2 : index
    %c0_227 = arith.constant 0 : index
    %337 = vector.load %arg1[%c0_224, %c3_225, %c2_226, %c0_227] : memref<1x4x16x16xf32, #tpu.memory_space<vmem>>, vector<1x1x13x13xf32>
    %338 = vector.shape_cast %337 : vector<1x1x13x13xf32> to vector<13x13xf32>
    %c56 = arith.constant 56 : index
    %339 = memref.load %arg2[%c56] : memref<64xf32, #tpu.memory_space<smem>>
    %340 = vector.broadcast %339 : f32 to vector<13x13xf32>
    %341 = arith.mulf %338, %340 : vector<13x13xf32>
    %342 = arith.addf %336, %341 : vector<13x13xf32>
    %c0_228 = arith.constant 0 : index
    %c3_229 = arith.constant 3 : index
    %c2_230 = arith.constant 2 : index
    %c1_231 = arith.constant 1 : index
    %343 = vector.load %arg1[%c0_228, %c3_229, %c2_230, %c1_231] : memref<1x4x16x16xf32, #tpu.memory_space<vmem>>, vector<1x1x13x13xf32>
    %344 = vector.shape_cast %343 : vector<1x1x13x13xf32> to vector<13x13xf32>
    %c57 = arith.constant 57 : index
    %345 = memref.load %arg2[%c57] : memref<64xf32, #tpu.memory_space<smem>>
    %346 = vector.broadcast %345 : f32 to vector<13x13xf32>
    %347 = arith.mulf %344, %346 : vector<13x13xf32>
    %348 = arith.addf %342, %347 : vector<13x13xf32>
    %c0_232 = arith.constant 0 : index
    %c3_233 = arith.constant 3 : index
    %c2_234 = arith.constant 2 : index
    %c2_235 = arith.constant 2 : index
    %349 = vector.load %arg1[%c0_232, %c3_233, %c2_234, %c2_235] : memref<1x4x16x16xf32, #tpu.memory_space<vmem>>, vector<1x1x13x13xf32>
    %350 = vector.shape_cast %349 : vector<1x1x13x13xf32> to vector<13x13xf32>
    %c58 = arith.constant 58 : index
    %351 = memref.load %arg2[%c58] : memref<64xf32, #tpu.memory_space<smem>>
    %352 = vector.broadcast %351 : f32 to vector<13x13xf32>
    %353 = arith.mulf %350, %352 : vector<13x13xf32>
    %354 = arith.addf %348, %353 : vector<13x13xf32>
    %c0_236 = arith.constant 0 : index
    %c3_237 = arith.constant 3 : index
    %c2_238 = arith.constant 2 : index
    %c3_239 = arith.constant 3 : index
    %355 = vector.load %arg1[%c0_236, %c3_237, %c2_238, %c3_239] : memref<1x4x16x16xf32, #tpu.memory_space<vmem>>, vector<1x1x13x13xf32>
    %356 = vector.shape_cast %355 : vector<1x1x13x13xf32> to vector<13x13xf32>
    %c59 = arith.constant 59 : index
    %357 = memref.load %arg2[%c59] : memref<64xf32, #tpu.memory_space<smem>>
    %358 = vector.broadcast %357 : f32 to vector<13x13xf32>
    %359 = arith.mulf %356, %358 : vector<13x13xf32>
    %360 = arith.addf %354, %359 : vector<13x13xf32>
    %c0_240 = arith.constant 0 : index
    %c3_241 = arith.constant 3 : index
    %c3_242 = arith.constant 3 : index
    %c0_243 = arith.constant 0 : index
    %361 = vector.load %arg1[%c0_240, %c3_241, %c3_242, %c0_243] : memref<1x4x16x16xf32, #tpu.memory_space<vmem>>, vector<1x1x13x13xf32>
    %362 = vector.shape_cast %361 : vector<1x1x13x13xf32> to vector<13x13xf32>
    %c60 = arith.constant 60 : index
    %363 = memref.load %arg2[%c60] : memref<64xf32, #tpu.memory_space<smem>>
    %364 = vector.broadcast %363 : f32 to vector<13x13xf32>
    %365 = arith.mulf %362, %364 : vector<13x13xf32>
    %366 = arith.addf %360, %365 : vector<13x13xf32>
    %c0_244 = arith.constant 0 : index
    %c3_245 = arith.constant 3 : index
    %c3_246 = arith.constant 3 : index
    %c1_247 = arith.constant 1 : index
    %367 = vector.load %arg1[%c0_244, %c3_245, %c3_246, %c1_247] : memref<1x4x16x16xf32, #tpu.memory_space<vmem>>, vector<1x1x13x13xf32>
    %368 = vector.shape_cast %367 : vector<1x1x13x13xf32> to vector<13x13xf32>
    %c61 = arith.constant 61 : index
    %369 = memref.load %arg2[%c61] : memref<64xf32, #tpu.memory_space<smem>>
    %370 = vector.broadcast %369 : f32 to vector<13x13xf32>
    %371 = arith.mulf %368, %370 : vector<13x13xf32>
    %372 = arith.addf %366, %371 : vector<13x13xf32>
    %c0_248 = arith.constant 0 : index
    %c3_249 = arith.constant 3 : index
    %c3_250 = arith.constant 3 : index
    %c2_251 = arith.constant 2 : index
    %373 = vector.load %arg1[%c0_248, %c3_249, %c3_250, %c2_251] : memref<1x4x16x16xf32, #tpu.memory_space<vmem>>, vector<1x1x13x13xf32>
    %374 = vector.shape_cast %373 : vector<1x1x13x13xf32> to vector<13x13xf32>
    %c62 = arith.constant 62 : index
    %375 = memref.load %arg2[%c62] : memref<64xf32, #tpu.memory_space<smem>>
    %376 = vector.broadcast %375 : f32 to vector<13x13xf32>
    %377 = arith.mulf %374, %376 : vector<13x13xf32>
    %378 = arith.addf %372, %377 : vector<13x13xf32>
    %c0_252 = arith.constant 0 : index
    %c3_253 = arith.constant 3 : index
    %c3_254 = arith.constant 3 : index
    %c3_255 = arith.constant 3 : index
    %379 = vector.load %arg1[%c0_252, %c3_253, %c3_254, %c3_255] : memref<1x4x16x16xf32, #tpu.memory_space<vmem>>, vector<1x1x13x13xf32>
    %380 = vector.shape_cast %379 : vector<1x1x13x13xf32> to vector<13x13xf32>
    %c63 = arith.constant 63 : index
    %381 = memref.load %arg2[%c63] : memref<64xf32, #tpu.memory_space<smem>>
    %382 = vector.broadcast %381 : f32 to vector<13x13xf32>
    %383 = arith.mulf %380, %382 : vector<13x13xf32>
    %384 = arith.addf %378, %383 : vector<13x13xf32>
    %c0_256 = arith.constant 0 : index
    %385 = memref.load %arg3[%c0_256] : memref<1xf32, #tpu.memory_space<smem>>
    %386 = vector.broadcast %385 : f32 to vector<13x13xf32>
    %387 = arith.addf %384, %386 : vector<13x13xf32>
    %c0_257 = arith.constant 0 : index
    %c0_258 = arith.constant 0 : index
    %c0_259 = arith.constant 0 : index
    %388 = vector.load %arg4[%c0_257, %c0_258, %c0_259] : memref<1x13x13xf32, #tpu.memory_space<vmem>>, vector<1x13x13xf32>
    %389 = vector.shape_cast %388 : vector<1x13x13xf32> to vector<13x13xf32>
    %390 = vector.shape_cast %387 : vector<13x13xf32> to vector<1x13x13xf32>
    tpu.vector_store %arg4[%c0_257, %c0_258, %c0_259], %390 {strides = array<i32>} : memref<1x13x13xf32, #tpu.memory_space<vmem>>, vector<1x13x13xf32>,
    return
  }
  func.func @transform_0(%arg0: i32) -> (i32, i32, i32, i32) {
    %c0_i32 = arith.constant 0 : i32
    %c0_i32_0 = arith.constant 0 : i32
    %c0_i32_1 = arith.constant 0 : i32
    %c0_i32_2 = arith.constant 0 : i32
    return %arg0, %c0_i32, %c0_i32_0, %c0_i32_1 : i32, i32, i32, i32
  }
  func.func @transform_1(%arg0: i32) -> i32 {
    %c0_i32 = arith.constant 0 : i32
    %c0_i32_0 = arith.constant 0 : i32
    return %c0_i32 : i32
  }
  func.func @transform_2(%arg0: i32) -> i32 {
    %c0_i32 = arith.constant 0 : i32
    %c0_i32_0 = arith.constant 0 : i32
    return %c0_i32 : i32
  }
  func.func @transform_3(%arg0: i32) -> (i32, i32, i32) {
    %c0_i32 = arith.constant 0 : i32
    %c0_i32_0 = arith.constant 0 : i32
    %c0_i32_1 = arith.constant 0 : i32
    return %arg0, %c0_i32, %c0_i32_0 : i32, i32, i32
  }
}

</mosaic_0001>

<bundles_post_ra>
// kernel: tpu_custom_call.1
= control target key start
LH: loop header
LB: loop body
LE: loop exit
PB: predicated region body
PF: predicated region fallthrough
CT: control target
= control target key end

     0   :  { %s1893_s0 = inlined_call_operand.hbm [shape: f32[2,4,16,16], index: 0, kind: input, shape index: {}]   ;;  %s1894_s1 = inlined_call_operand.vmem [shape: f32[64], index: 1, kind: input, shape index: {}]   ;;  %s1895_s2 = inlined_call_operand.<no memory space> [shape: f32[1], index: 2, kind: input, shape index: {}]   ;;  %s1896_s3 = inlined_call_operand.vmem [shape: f32[2,13,13], index: 3, kind: output, shape index: {}]  }
   0x1   :  { %8 = sst [smem:[#allocation2]] %s1895_s2 }
   0x2   :  { %9 = vsyncpa [#allocation4], 0 }
   0x3   :  { %11 = vsyncpa [#allocation4 + $0x1], 0 }
   0x4   :  { %12 = vsyncpa [#allocation5], 0  ;;  %s1369_s14 = smov 0   ;;  %s1371_s15 = smov 0  }
   0x5   :  { %s1373_s16 = smov 0   ;;  %s1375_s17 = smov 0  }
   0x6 LB: > { %s1388_s2 = sadd.s32 4294967295, %s1337_s17   ;;  %s1391_s18 = sadd.s32 1, %s1337_s17   ;;  %s1337_s17 = sphi %s1375_s17, %s1908_s17   ;;  %s1333_s16 = sphi %s1373_s16, %s1907_s16   ;;  %s1329_s15 = sphi %s1371_s15, %s1906_s15   ;;  %s1325_s14 = sphi %s1369_s14, %s1905_s14  }
   0x7   : > { %s22_s19 = ssub.s32 %s1337_s17, %s1391_s18  ;;  %s25_s20 = sadd.s32 1, %s1333_s16 }
   0x8   : > { %p23_p0 = scmp.eq.s32.totalorder %s22_s19, 0  ;;  %p32_p1 = scmp.ne.s32.totalorder %s1333_s16, %s1329_s15 }
   0x9   : > { %p33_p2 = scmp.eq.s32.totalorder %s1337_s17, 0  ;;  %p38_p3 = scmp.ne.s32.totalorder %s1329_s15, %s1325_s14 }
   0xa   : > { %s1401_s21 = scalar_select %p23_p0, %s1333_s16, %s25_s20  }
   0xb   : > { %p34_p4 = por %p33_p2, %p32_p1  ;;  %p39_p5 = scmp.eq.s32.totalorder %s1388_s2, 0 }
   0xc   : > { %p1097_p6 = scmp.ge.s32.totalorder %s1337_s17, 1  ;;  %p117_p7 = scmp.lt.s32.totalorder %s1337_s17, 3 }
   0xd   : > { %p1408_p8 = por %p39_p5, %p38_p3  ;;  %s130_s26 = sshll.u32 %s1894_s1, 4  ;;  %s131_s26 = int_to_ptr.vmem [resolvable:$true] %s130_s26 }
   0xe   : > { %p1412_p9 = pnand %p1097_p6, %p117_p7  ;;  %p1214_p11 = scmp.lt.s32.totalorder %s1337_s17, 2 }
   0xf   : > { %s1899_s22 = scalar_select %p1408_p8, 1, 0 }
  0x10   : > { %s1900_s23 = scalar_select %p1412_p9, 1, 0 }
  0x11   : > { %p1205_p10 = pneg %p1412_p9  ;;  %s144_s27 = sand.u32 1, %s1333_s16  }
  0x12   : > { %p1429_p13 = pnand %p1214_p11, %p34_p4  ;;  %s1100_s30 = sshll.u32 %s144_s27, 6 }
  0x13   : > { %p1425_p12 = pnand %p1205_p10, %p39_p5  ;;  %s1254_s4 = scalar_lea.vmem %s131_s26, 16 }
  0x14   : > { %p1255_p0 = scmp.ne.s32.totalorder %s131_s26, %s1254_s4  ;;  %p1262_p6 = scmp.lt.s32.totalorder %s131_s26, %s131_s26 }
  0x15   : > { %p1256_p1 = pneg %p1425_p12  ;;  %p1263_p7 = scmp.lt.s32.totalorder %s1254_s4, %s1254_s4 }
  0x17   : > { %p1257_p2 = pnand %p1256_p1, %p1255_p0  ;;  %p1264_p8 = por %p1263_p7, %p1262_p6 }
  0x19   : > { %p1258_p3 = pneg %p1257_p2 }
  0x1b   : > { %p1265_p9 = pnand %p1264_p8, %p1258_p3 }
  0x1d   : > { %1268 = shalt.err (!%p1265_p9)
}
  0x1e   : > { %s1339_s5 = smov [#allocation6]   ;;  %s1197_s6 = sshll.u32 %s1337_s17, 10 }
  0x1f   : > { %1208 = dma.vmem_to_smem (!%p1425_p12), %s131_s26, 16, %s1339_s5, [#allocation5]  }
  0x20   : > { %s1441_s9 = scalar_lea.hbm %s1893_s0, %s1197_s6  ;;  %s148_s10 = scalar_lea.vmem [#allocation3], %s1100_s30 }
  0x21   : > { %s155_s11 = sshll.u32 %s148_s10, 4  ;;  %s1445_s12 = scalar_lea.sflag [#allocation4], %s144_s27  ;;  %s1443_s11 = int_to_ptr.vmem [resolvable:$true] %s155_s11 }
  0x22   : > { %s1269_s13 = scalar_lea.hbm %s1441_s9, 1024  ;;  %p1271_p8 = pneg %p1429_p13 }
  0x23   : > { %p1270_p4 = scmp.ne.s32.totalorder %s1441_s9, %s1269_s13  ;;  %s1274_s19 = scalar_lea.hbm %s1893_s0, 2048 }
  0x24   : > { %p1275_p11 = scmp.lt.u32.totalorder %s1441_s9, %s1893_s0  ;;  %p1276_p12 = scmp.lt.u32.totalorder %s1274_s19, %s1269_s13 }
  0x25   : > { %p1272_p9 = pnand %p1271_p8, %p1270_p4  ;;  %p1278_p1 = scmp.lt.u32.totalorder %s1269_s13, %s1441_s9 }
  0x26   : > { %p1277_p0 = por %p1276_p12, %p1275_p11 }
  0x27   : > { %p1273_p10 = pneg %p1272_p9 }
  0x28   : > { %p1279_p2 = por %p1278_p1, %p1277_p0 }
  0x2a   : > { %p1280_p3 = pnand %p1279_p2, %p1273_p10 }
  0x2c   : > { %1283 = shalt.err (!%p1280_p3)
}
  0x2d   : > { %s1284_s25 = scalar_lea.vmem %s1443_s11, 1024  ;;  %s1340_s26 = smov [#allocation3]  }
  0x2e   : > { %p1285_p6 = scmp.ne.s32.totalorder %s1443_s11, %s1284_s25  ;;  %s1289_s27 = sshll.u32 %s1340_s26, 4  ;;  %s1290_s27 = int_to_ptr.vmem [resolvable:$false] %s1289_s27 }
  0x2f   : > { %s1291_s28 = scalar_lea.vmem %s1290_s27, 2048  ;;  %p1292_p9 = scmp.lt.s32.totalorder %s1443_s11, %s1290_s27 }
  0x30   : > { %p1287_p7 = pnand %p1285_p6, %p1271_p8  ;;  %p1293_p11 = scmp.lt.s32.totalorder %s1291_s28, %s1284_s25 }
  0x32   : > { %p1288_p4 = pneg %p1287_p7  ;;  %p1294_p12 = por %p1293_p11, %p1292_p9 }
  0x34   : > { %p1295_p0 = pnand %p1294_p12, %p1288_p4 }
  0x36   : > { %1298 = shalt.err (!%p1295_p0)
}
  0x37   : > { %s1341_s30 = smov 128   ;;  %s1342_s4 = smov 8  }
  0x38   : > { %1212 = dma.hbm_to_vmem [thread:$0]  (!%p1429_p13), %s1441_s9, 1024, %s1443_s11, %s1445_s12, %s1341_s30, %s1341_s30, %s1342_s4  }
  0x39   : > { %p1903_p8 = scmp.ne.s32.totalorder %s1900_s23, 0 }
  0x3a   : > { %s169_s5 = sand.u32 (!%p1903_p8), 1, %s1329_s15   ;;  %p1904_p10 = scmp.ne.s32.totalorder (!%p1903_p8), %s1899_s22, 0 }
  0x3b   : > { %167 = sbr.rel (%p1903_p8) target bundleno = 389 (0x185), region = 32  ;;  %s1104_s6 = sshll.u32 (!%p1903_p8), %s169_s5, 6 }
  0x3c   : > { %s170_s7 = scalar_lea.sflag (!%p1903_p8), [#allocation4], %s169_s5  ;;  %s1476_s8 = scalar_lea.vmem (!%p1903_p8), [#allocation3], %s1104_s6 }
  0x42   : > { %1316 = dma.done.wait (%p1904_p10), %s170_s7, 1024  }
  0x43   : > { %1318 = vsyncadd (%p1904_p10), %s170_s7, 4294966272 }
  0x44   : > { %1320 = dma.done.wait (%p39_p5), [#allocation5], 16  }
  0x45   : > { %1322 = vsyncadd (%p39_p5), [#allocation5], 4294967280 }
  0x46   : > { %182 = sfence }
  0x47   : > { %s1109_s23 = sld [smem:[#allocation6 + $0x2]]  ;;  %s1108_s29 = sld [smem:[#allocation6 + $0x1]]  ;;  %v1487_v0 = vld [vmem:[%s1476_s8] sm:$0xff]  ;;  %v1490_v1 = vld [vmem:[%s1476_s8 + $0x8] sm:$0x1f]  ;;  %v1560_v46 = vld [vmem:[%s1476_s8 + $0x10] sm:$0xff] }
  0x48   : > { %s1110_s9 = sld [smem:[#allocation6 + $0x3]]  ;;  %s1112_s10 = sld [smem:[#allocation6 + $0x5]]  ;;  %v1503_v11 = vld [vmem:[%s1476_s8 + $0x9] sm:$0x1f]  ;;  %v1506_v13 = vld [vmem:[%s1476_s8 + $0x1] sm:$0xff]  ;;  %v1578_v57 = vld [vmem:[%s1476_s8 + $0x11] sm:$0xff] }
  0x49   : > { %s1343_s22 = smov 126   ;;  %s1344_s11 = smov 127   ;;  %v1521_v22 = vld [vmem:[%s1476_s8 + $0xa] sm:$0x1f]  ;;  %v1524_v24 = vld [vmem:[%s1476_s8 + $0x2] sm:$0xff]  ;;  %vm1015_vm0 = vcmask 102400  }
  0x4a   : > { %s1113_s12 = sld [smem:[#allocation6 + $0x6]]  ;;  %s1114_s13 = sld [smem:[#allocation6 + $0x7]]  ;;  %v1539_v33 = vld [vmem:[%s1476_s8 + $0xb] sm:$0x1f]  ;;  %v1542_v35 = vld [vmem:[%s1476_s8 + $0x3] sm:$0xff]  ;;  %vm1013_vm1 = vcmask 105472  }
  0x4b   : > { %s1345_s14 = smov 125   ;;  %s1116_s17 = sld [smem:[#allocation6 + $0x9]]  ;;  %v1557_v44 = vld [vmem:[%s1476_s8 + $0x18] sm:$0x1f] }
  0x4c   : > { %s1117_s19 = sld [smem:[#allocation6 + $0xa]]  ;;  %s1118_s20 = sld [smem:[#allocation6 + $0xb]]  ;;  %v1575_v55 = vld [vmem:[%s1476_s8 + $0x19] sm:$0x1f] }
  0x4d   : > { %v229_v2 = vstv %s1109_s23  ;;  %v215_v4 = vstv %s1108_s29  ;;  %s1120_s24 = sld [smem:[#allocation6 + $0xd]]  ;;  %s1121_s25 = sld [smem:[#allocation6 + $0xe]] }
  0x4e   : > { %v230_v3 = vmul.f32 %v229_v2, %v1487_v0  ;;  %v216_v5 = vmul.f32 %v215_v4, %v1487_v0  ;;  %v231_v6 = vmul.f32 %v229_v2, %v1490_v1  ;;  %v217_v7 = vmul.f32 %v215_v4, %v1490_v1  ;;  %s1122_s26 = sld [smem:[#allocation6 + $0xf]]  ;;  %s1126_s27 = sld [smem:[#allocation6 + $0x11]]  ;;  %v1593_v4 = vld [vmem:[%s1476_s8 + $0x1a] sm:$0x1f] }
  0x4f   : > { %v243_v8 = vstv %s1110_s9  ;;  %v265_v12 = vstv %s1112_s10  ;;  %s1127_s28 = sld [smem:[#allocation6 + $0x12]]  ;;  %s1128_s30 = sld [smem:[#allocation6 + $0x13]] }
  0x50   : > { %234 = vrot.lane.b32.xlu1 %v230_v3, %s1343_s22  ;;  %220 = vrot.lane.b32.xlu0 %v216_v5, %s1344_s11  ;;  %v245_v9 = vmul.f32 %v243_v8, %v1490_v1  ;;  %v244_v10 = vmul.f32 %v243_v8, %v1487_v0  ;;  %v267_v14 = vmul.f32 %v265_v12, %v1503_v11  ;;  %v279_v16 = vstv %s1113_s12  ;;  %s1132_s4 = sld [smem:[#allocation6 + $0x15]]  ;;  %s1133_s5 = sld [smem:[#allocation6 + $0x16]] }
  0x51   : > { %v266_v15 = vmul.f32 %v265_v12, %v1506_v13  ;;  %v281_v17 = vmul.f32 %v279_v16, %v1503_v11  ;;  %v280_v18 = vmul.f32 %v279_v16, %v1506_v13  ;;  %v293_v19 = vstv %s1114_s13  ;;  %s1134_s6 = sld [smem:[#allocation6 + $0x17]]  ;;  %s1138_s7 = sld [smem:[#allocation6 + $0x19]] }
  0x52   : > { %v295_v20 = vmul.f32 %v293_v19, %v1503_v11  ;;  %v294_v21 = vmul.f32 %v293_v19, %v1506_v13  ;;  %v315_v23 = vstv %s1116_s17  ;;  %v329_v27 = vstv %s1117_s19  ;;  %s1139_s23 = sld [smem:[#allocation6 + $0x1a]]  ;;  %s1140_s29 = sld [smem:[#allocation6 + $0x1b]]  ;;  %v1614_v19 = vld [vmem:[%s1476_s8 + $0x13] sm:$0xff] }
  0x53   : > { %v317_v25 = vmul.f32 %v315_v23, %v1521_v22  ;;  %v316_v26 = vmul.f32 %v315_v23, %v1524_v24  ;;  %v331_v28 = vmul.f32 %v329_v27, %v1521_v22  ;;  %v330_v29 = vmul.f32 %v329_v27, %v1524_v24  ;;  %s1144_s9 = sld [smem:[#allocation6 + $0x1d]]  ;;  %s1145_s10 = sld [smem:[#allocation6 + $0x1e]] }
  0x54   : > { %236 = vrot.lane.b32.xlu1 %v231_v6, %s1343_s22  ;;  %222 = vrot.lane.b32.xlu0 %v217_v7, %s1344_s11  ;;  %v343_v30 = vstv %s1118_s20  ;;  %v365_v34 = vstv %s1120_s24  ;;  %s1146_s12 = sld [smem:[#allocation6 + $0x1f]]  ;;  %s1150_s13 = sld [smem:[#allocation6 + $0x21]] }
  0x55   : > { %v345_v31 = vmul.f32 %v343_v30, %v1521_v22  ;;  %v344_v32 = vmul.f32 %v343_v30, %v1524_v24  ;;  %v367_v36 = vmul.f32 %v365_v34, %v1539_v33  ;;  %v366_v37 = vmul.f32 %v365_v34, %v1542_v35  ;;  %v1596_v6 = vld [vmem:[%s1476_s8 + $0x12] sm:$0xff]  ;;  %s1151_s17 = sld [smem:[#allocation6 + $0x22]]  ;;  %v1629_v30 = vld [vmem:[%s1476_s8 + $0x28] sm:$0x1f]  ;;  %s1152_s19 = sld [smem:[#allocation6 + $0x23]] }
  0x56   : > { %v379_v38 = vstv %s1121_s25  ;;  %v393_v41 = vstv %s1122_s26  ;;  %v416_v45 = vstv %s1126_s27  ;;  %v430_v49 = vstv %s1127_s28  ;;  %s1156_s20 = sld [smem:[#allocation6 + $0x25]]  ;;  %s1157_s24 = sld [smem:[#allocation6 + $0x26]] }
  0x57   : > { %v381_v39 = vmul.f32 %v379_v38, %v1539_v33  ;;  %v380_v40 = vmul.f32 %v379_v38, %v1542_v35  ;;  %v395_v42 = vmul.f32 %v393_v41, %v1539_v33  ;;  %v394_v43 = vmul.f32 %v393_v41, %v1542_v35  ;;  %s1649_s25 = sld [smem:[#allocation6]]  ;;  %s1158_s26 = sld [smem:[#allocation6 + $0x27]] }
  0x58   : > { %250 = vrot.lane.b32.xlu1 %v245_v9, %s1345_s14  ;;  %248 = vrot.lane.b32.xlu0 %v244_v10, %s1345_s14  ;;  %v418_v47 = vmul.f32 %v1557_v44, %v416_v45  ;;  %v417_v48 = vmul.f32 %v1560_v46, %v416_v45  ;;  %v432_v50 = vmul.f32 %v1557_v44, %v430_v49  ;;  %v444_v52 = vstv %s1128_s30  ;;  %s1162_s27 = sld [smem:[#allocation6 + $0x29]]  ;;  %s1163_s28 = sld [smem:[#allocation6 + $0x2a]] }
  0x59   : > { %v431_v51 = vmul.f32 %v1560_v46, %v430_v49  ;;  %v446_v53 = vmul.f32 %v1557_v44, %v444_v52  ;;  %v445_v54 = vmul.f32 %v1560_v46, %v444_v52  ;;  %v466_v56 = vstv %s1132_s4  ;;  %s1663_s30 = sld [smem:[#allocation6 + $0x4]]  ;;  %s1673_s4 = sld [smem:[#allocation6 + $0x2b]] }
  0x5a   : > { %v468_v58 = vmul.f32 %v1575_v55, %v466_v56  ;;  %v467_v59 = vmul.f32 %v1578_v57, %v466_v56  ;;  %v480_v60 = vstv %s1133_s5  ;;  %v494_v63 = vstv %s1134_s6  ;;  %s1683_s5 = sld [smem:[#allocation6 + $0x2d]]  ;;  %s1691_s6 = sld [smem:[#allocation6 + $0x2e]] }
  0x5b   : > { %v482_v61 = vmul.f32 %v1575_v55, %v480_v60  ;;  %v481_v62 = vmul.f32 %v1578_v57, %v480_v60  ;;  %v496_v2 = vmul.f32 %v1575_v55, %v494_v63  ;;  %v495_v3 = vmul.f32 %v1578_v57, %v494_v63  ;;  %v1671_v60 = vld [vmem:[%s1476_s8 + $0x2a] sm:$0x1f]  ;;  %v1676_v63 = vld [vmem:[%s1476_s8 + $0x22] sm:$0xff]  ;;  %p201_p5 = scmp.lt.s32.totalorder %s1388_s2, 1 }
  0x5c   : > { %272 = vrot.lane.b32.xlu1 %v267_v14, %s1344_s11  ;;  %270 = vrot.lane.b32.xlu0 %v266_v15, %s1344_s11  ;;  %v516_v5 = vstv %s1138_s7  ;;  %v530_v9 = vstv %s1139_s23  ;;  %s1695_s7 = sld [smem:[#allocation6 + $0x8]]  ;;  %s1705_s23 = sld [smem:[#allocation6 + $0x2f]] }
  0x5d   : > { %v518_v7 = vmul.f32 %v1593_v4, %v516_v5  ;;  %v517_v8 = vmul.f32 %v1596_v6, %v516_v5  ;;  %v532_v10 = vmul.f32 %v1593_v4, %v530_v9  ;;  %v531_v12 = vmul.f32 %v1596_v6, %v530_v9  ;;  %s1910_s2 = smov (!%p201_p5, %s1388_s2), 1 }
  0x5e   : > { %v544_v14 = vstv %s1140_s29  ;;  %v580_v23 = vstv %s1145_s10  ;;  %v594_v27 = vstv %s1146_s12  ;;  %v667_v45 = vstv %s1156_s20  ;;  %s1715_s29 = sld [smem:[#allocation6 + $0x31]]  ;;  %s1727_s10 = sld [smem:[#allocation6 + $0xc]] }
  0x5f   : > { %v546_v15 = vmul.f32 %v1593_v4, %v544_v14  ;;  %v545_v16 = vmul.f32 %v1596_v6, %v544_v14  ;;  %v259_v14 = vstv %s1663_s30  ;;  %s1737_s12 = sld [smem:[#allocation6 + $0x33]]  ;;  %s1769_s20 = sld [smem:[#allocation6 + $0x37]] }
  0x60   : > { %286 = vrot.lane.b32.xlu1 %v281_v17, %s1343_s22  ;;  %284 = vrot.lane.b32.xlu0 %v280_v18, %s1343_s22  ;;  %v1611_v17 = vld [vmem:[%s1476_s8 + $0x1b] sm:$0x1f]  ;;  %v566_v18 = vstv %s1144_s9  ;;  %s1724_s9 = sld [smem:[#allocation6 + $0x32]]  ;;  %s1820_s30 = sld [smem:[#allocation6 + $0x3e]] }
  0x64   : > { %300 = vrot.lane.b32.xlu1 %v295_v20, %s1345_s14  ;;  %298 = vrot.lane.b32.xlu0 %v294_v21, %s1345_s14  ;;  %v568_v20 = vmul.f32 %v1611_v17, %v566_v18  ;;  %v567_v21 = vmul.f32 %v1614_v19, %v566_v18  ;;  %v745_v18 = vstv %s1673_s4  ;;  %s1823_s4 = sld [smem:[#allocation6 + $0x18]] }
  0x68   : > { %322 = vrot.lane.b32.xlu1 %v317_v25, %s1344_s11  ;;  %320 = vrot.lane.b32.xlu0 %v316_v26, %s1344_s11  ;;  %v582_v25 = vmul.f32 %v1611_v17, %v580_v23  ;;  %v581_v26 = vmul.f32 %v1614_v19, %v580_v23 }
  0x6c   : > { %336 = vrot.lane.b32.xlu1 %v331_v28, %s1343_s22  ;;  %334 = vrot.lane.b32.xlu0 %v330_v29, %s1343_s22  ;;  %v596_v28 = vmul.f32 %v1611_v17, %v594_v27  ;;  %v595_v29 = vmul.f32 %v1614_v19, %v594_v27 }
  0x70   : > { %350 = vrot.lane.b32.xlu1 %v345_v31, %s1345_s14  ;;  %348 = vrot.lane.b32.xlu0 %v344_v32, %s1345_s14  ;;  %v617_v31 = vstv %s1150_s13  ;;  %v1632_v32 = vld [vmem:[%s1476_s8 + $0x20] sm:$0xff]  ;;  %s1747_s13 = sld [smem:[#allocation6 + $0x35]] }
  0x71   : > { %v619_v34 = vmul.f32 %v1629_v30, %v617_v31 }
  0x74   : > { %372 = vrot.lane.b32.xlu1 %v367_v36, %s1344_s11  ;;  %370 = vrot.lane.b32.xlu0 %v366_v37, %s1344_s11  ;;  %v618_v36 = vmul.f32 %v1632_v32, %v617_v31  ;;  %v631_v37 = vstv %s1151_s17  ;;  %v746_v31 = vmul.f32 %v1676_v63, %v745_v18  ;;  %s1756_s17 = sld [smem:[#allocation6 + $0x36]] }
  0x75   : > { %v633_v38 = vmul.f32 %v1629_v30, %v631_v37 }
  0x78   : > { %386 = vrot.lane.b32.xlu1 %v381_v39, %s1343_s22  ;;  %384 = vrot.lane.b32.xlu0 %v380_v40, %s1343_s22  ;;  %v632_v39 = vmul.f32 %v1632_v32, %v631_v37  ;;  %v645_v40 = vstv %s1152_s19  ;;  %s1759_s19 = sld [smem:[#allocation6 + $0x10]] }
  0x79   : > { %v647_v41 = vmul.f32 %v1629_v30, %v645_v40 }
  0x7c   : > { %400 = vrot.lane.b32.xlu1 %v395_v42, %s1345_s14  ;;  %398 = vrot.lane.b32.xlu0 %v394_v43, %s1345_s14  ;;  %v646_v42 = vmul.f32 %v1632_v32, %v645_v40  ;;  %v1647_v43 = vld [vmem:[%s1476_s8 + $0x29] sm:$0x1f] }
  0x80   : > { %423 = vrot.lane.b32.xlu1 %v418_v47, %s1344_s11  ;;  %421 = vrot.lane.b32.xlu0 %v417_v48, %s1344_s11  ;;  %v1652_v47 = vld [vmem:[%s1476_s8 + $0x21] sm:$0xff]  ;;  %v669_v48 = vmul.f32 %v1647_v43, %v667_v45 }
  0x81   : > { %v668_v49 = vmul.f32 %v1652_v47, %v667_v45 }
  0x84   : > { %437 = vrot.lane.b32.xlu1 %v432_v50, %s1343_s22  ;;  %435 = vrot.lane.b32.xlu0 %v431_v51, %s1343_s22  ;;  %v681_v50 = vstv %s1157_s24  ;;  %s1779_s24 = sld [smem:[#allocation6 + $0x39]] }
  0x85   : > { %v683_v51 = vmul.f32 %v1647_v43, %v681_v50  ;;  %v682_v52 = vmul.f32 %v1652_v47, %v681_v50 }
  0x88   : > { %451 = vrot.lane.b32.xlu1 %v446_v53, %s1345_s14  ;;  %449 = vrot.lane.b32.xlu0 %v445_v54, %s1345_s14  ;;  %v209_v53 = vstv %s1649_s25  ;;  %v695_v54 = vstv %s1158_s26  ;;  %s1788_s25 = sld [smem:[#allocation6 + $0x3a]]  ;;  %s1791_s26 = sld [smem:[#allocation6 + $0x14]] }
  0x89   : > { %v210_v56 = vmul.f32 %v209_v53, %v1487_v0  ;;  %v211_v0 = vmul.f32 %v209_v53, %v1490_v1 }
  0x8c   : > { %473 = vrot.lane.b32.xlu1 %v468_v58, %s1344_s11  ;;  %471 = vrot.lane.b32.xlu0 %v467_v59, %s1344_s11  ;;  %v697_v58 = vmul.f32 %v1647_v43, %v695_v54  ;;  %v696_v59 = vmul.f32 %v1652_v47, %v695_v54 }
  0x90   : > { %487 = vrot.lane.b32.xlu1 %v482_v61, %s1343_s22  ;;  %485 = vrot.lane.b32.xlu0 %v481_v62, %s1343_s22  ;;  %v717_v61 = vstv %s1162_s27  ;;  %s1801_s27 = sld [smem:[#allocation6 + $0x3b]] }
  0x91   : > { %v719_v5 = vmul.f32 %v1671_v60, %v717_v61 }
  0x94   : > { %501 = vrot.lane.b32.xlu1 %v496_v2, %s1345_s14  ;;  %499 = vrot.lane.b32.xlu0 %v495_v3, %s1345_s14 }
  0x98   : > { %523 = vrot.lane.b32.xlu1 %v518_v7, %s1344_s11  ;;  %521 = vrot.lane.b32.xlu0 %v517_v8, %s1344_s11  ;;  %v718_v7 = vmul.f32 %v1676_v63, %v717_v61  ;;  %v731_v8 = vstv %s1163_s28  ;;  %s1811_s28 = sld [smem:[#allocation6 + $0x3d]] }
  0x99   : > { %v732_v1 = vmul.f32 %v1676_v63, %v731_v8 }
  0x9c   : > { %537 = vrot.lane.b32.xlu1 %v532_v10, %s1343_s22  ;;  %535 = vrot.lane.b32.xlu0 %v531_v12, %s1343_s22 }
  0xa0   : > { %551 = vrot.lane.b32.xlu1 %v546_v15, %s1345_s14  ;;  %549 = vrot.lane.b32.xlu0 %v545_v16, %s1345_s14  ;;  %v733_v16 = vmul.f32 %v1671_v60, %v731_v8  ;;  %v1734_v8 = vld [vmem:[%s1476_s8 + $0x38] sm:$0x1f] }
  0xa4   : > { %573 = vrot.lane.b32.xlu1 %v568_v20, %s1344_s11  ;;  %571 = vrot.lane.b32.xlu0 %v567_v21, %s1344_s11  ;;  %v261_v21 = vmul.f32 %v259_v14, %v1503_v11  ;;  %v1702_v11 = vld [vmem:[%s1476_s8 + $0x2b] sm:$0x1f] }
  0xa8   : > { %587 = vrot.lane.b32.xlu1 %v582_v25, %s1343_s22  ;;  %585 = vrot.lane.b32.xlu0 %v581_v26, %s1343_s22  ;;  %v260_v25 = vmul.f32 %v259_v14, %v1506_v13 }
  0xac   : > { %601 = vrot.lane.b32.xlu1 %v596_v28, %s1345_s14  ;;  %599 = vrot.lane.b32.xlu0 %v595_v29, %s1345_s14  ;;  %v747_v29 = vmul.f32 %v1671_v60, %v745_v18 }
  0xb0   : > { %624 = vrot.lane.b32.xlu1 %v619_v34, %s1344_s11  ;;  %622 = vrot.lane.b32.xlu0 %v618_v36, %s1344_s11  ;;  %v767_v34 = vstv %s1683_s5  ;;  %s1833_s5 = sld [smem:[#allocation6 + $0x3f]] }
  0xb1   : > { %v769_v40 = vmul.f32 %v1702_v11, %v767_v34 }
  0xb4   : > { %638 = vrot.lane.b32.xlu1 %v633_v38, %s1343_s22  ;;  %636 = vrot.lane.b32.xlu0 %v632_v39, %s1343_s22  ;;  %v1708_v38 = vld [vmem:[%s1476_s8 + $0x23] sm:$0xff] }
  0xb8   : > { %652 = vrot.lane.b32.xlu1 %v647_v41, %s1345_s14  ;;  %650 = vrot.lane.b32.xlu0 %v646_v42, %s1345_s14  ;;  %v768_v41 = vmul.f32 %v1708_v38, %v767_v34  ;;  %v781_v42 = vstv %s1691_s6  ;;  %s1167_s6 = sld [smem:[#allocation6 + $0x2c]] }
  0xbc   : > { %674 = vrot.lane.b32.xlu1 %v669_v48, %s1344_s11  ;;  %672 = vrot.lane.b32.xlu0 %v668_v49, %s1344_s11  ;;  %v309_v48 = vstv %s1695_s7  ;;  %s1173_s7 = sld [smem:[#allocation6 + $0x30]] }
  0xbd   : > { %v311_v54 = vmul.f32 %v309_v48, %v1521_v22 }
  0xc0   : > { %688 = vrot.lane.b32.xlu1 %v683_v51, %s1343_s22  ;;  %686 = vrot.lane.b32.xlu0 %v682_v52, %s1343_s22  ;;  %v783_v52 = vmul.f32 %v1702_v11, %v781_v42 }
  0xc2   : > { %v235_v62 = vpop.permute.xlu1 %234  ;;  %v221_v2 = vpop.permute.xlu0 %220 }
  0xc3   : > { %v226_v3 = vadd.f32 %v221_v2, %v210_v56  ;;  %v782_v56 = vmul.f32 %v1708_v38, %v781_v42 }
  0xc4   : > { %702 = vrot.lane.b32.xlu1 %v697_v58, %s1345_s14  ;;  %700 = vrot.lane.b32.xlu0 %v696_v59, %s1345_s14  ;;  %v795_v58 = vstv %s1705_s23  ;;  %s1179_s23 = sld [smem:[#allocation6 + $0x34]] }
  0xc5   : > { %v240_v9 = vadd.f32 %v235_v62, %v226_v3  ;;  %v310_v62 = vmul.f32 %v309_v48, %v1524_v24  ;;  %v797_v22 = vmul.f32 %v1702_v11, %v795_v58  ;;  %v868_v48 = vstv %s1747_s13 }
  0xc6   : > { %v237_v10 = vpop.permute.xlu1 %236  ;;  %v223_v12 = vpop.permute.xlu0 %222 }
  0xc7   : > { %v227_v15 = vadd.f32 %v223_v12, %v211_v0  ;;  %v1740_v12 = vld [vmem:[%s1476_s8 + $0x30] sm:$0xff] }
  0xc8   : > { %724 = vrot.lane.b32.xlu1 %v719_v5, %s1344_s11  ;;  %722 = vrot.lane.b32.xlu0 %v718_v7, %s1344_s11  ;;  %v796_v7 = vmul.f32 %v1708_v38, %v795_v58  ;;  %v410_v58 = vstv %s1759_s19 }
  0xc9   : > { %v241_v20 = vadd.f32 %v237_v10, %v227_v15 }
  0xca   : > { %v251_v23 = vpop.permute.xlu1 %250  ;;  %v249_v26 = vpop.permute.xlu0 %248 }
  0xcb   : > { %v255_v27 = vadd.f32 %v251_v23, %v241_v20  ;;  %v254_v28 = vadd.f32 %v249_v26, %v240_v9  ;;  %v818_v9 = vstv %s1715_s29  ;;  %v359_v20 = vstv %s1727_s10  ;;  %s1185_s29 = sld [smem:[#allocation6 + $0x38]] }
  0xcc   : > { %738 = vrot.lane.b32.xlu1 %v733_v16, %s1343_s22  ;;  %736 = vrot.lane.b32.xlu0 %v732_v1, %s1343_s22  ;;  %v820_v15 = vmul.f32 %v1734_v8, %v818_v9  ;;  %v819_v16 = vmul.f32 %v1740_v12, %v818_v9  ;;  %v832_v1 = vstv %s1724_s9  ;;  %s1191_s9 = sld [smem:[#allocation6 + $0x3c]]  ;;  %s1009_s10 = sld [smem:[#allocation2]] }
  0xcd   : > { %v263_v13 = vadd.f32 %v261_v21, %v255_v27  ;;  %v262_v36 = vadd.f32 %v260_v25, %v254_v28  ;;  %v834_v26 = vmul.f32 %v1734_v8, %v832_v1  ;;  %v361_v28 = vmul.f32 %v359_v20, %v1539_v33 }
  0xce   : > { %v273_v37 = vpop.permute.xlu1 %272  ;;  %v271_v39 = vpop.permute.xlu0 %270 }
  0xcf   : > { %v277_v49 = vadd.f32 %v273_v37, %v263_v13  ;;  %v276_v51 = vadd.f32 %v271_v39, %v262_v36  ;;  %v360_v36 = vmul.f32 %v359_v20, %v1542_v35  ;;  %v918_v20 = vstv %s1779_s24 }
  0xd0   : > { %752 = vrot.lane.b32.xlu1 %v747_v29, %s1345_s14  ;;  %750 = vrot.lane.b32.xlu0 %v746_v31, %s1345_s14  ;;  %v833_v29 = vmul.f32 %v1740_v12, %v832_v1  ;;  %v846_v31 = vstv %s1737_s12  ;;  %s1198_s12 = sshll.u32 %s1910_s2, 4 }
  0xd1   : > { %v848_v33 = vmul.f32 %v1734_v8, %v846_v31  ;;  %v847_v42 = vmul.f32 %v1740_v12, %v846_v31  ;;  %v460_v31 = vstv %s1791_s26  ;;  %s205_s19 = scalar_lea.vmem %s1896_s3, %s1198_s12 }
  0xd2   : > { %v287_v45 = vpop.permute.xlu1 %286  ;;  %v285_v50 = vpop.permute.xlu0 %284 }
  0xd3   : > { %v291_v53 = vadd.f32 %v287_v45, %v277_v49  ;;  %v290_v59 = vadd.f32 %v285_v50, %v276_v51  ;;  %v1766_v45 = vld [vmem:[%s1476_s8 + $0x39] sm:$0x1f]  ;;  %v1772_v50 = vld [vmem:[%s1476_s8 + $0x31] sm:$0xff] }
  0xd4   : > { %774 = vrot.lane.b32.xlu1 %v769_v40, %s1344_s11  ;;  %772 = vrot.lane.b32.xlu0 %v768_v41, %s1344_s11 }
  0xd6   : > { %v301_v61 = vpop.permute.xlu1 %300  ;;  %v299_v3 = vpop.permute.xlu0 %298 }
  0xd7   : > { %v305_v2 = vadd.f32 %v301_v61, %v291_v53  ;;  %v304_v0 = vadd.f32 %v299_v3, %v290_v59  ;;  %v869_v53 = vmul.f32 %v1772_v50, %v868_v48 }
  0xd8   : > { %788 = vrot.lane.b32.xlu1 %v783_v52, %s1343_s22  ;;  %786 = vrot.lane.b32.xlu0 %v782_v56, %s1343_s22  ;;  %v870_v52 = vmul.f32 %v1766_v45, %v868_v48 }
  0xd9   : > { %v313_v5 = vadd.f32 %v311_v54, %v305_v2  ;;  %v312_v24 = vadd.f32 %v310_v62, %v304_v0  ;;  %v882_v54 = vstv %s1756_s17  ;;  %v412_v0 = vmul.f32 %v1557_v44, %v410_v58 }
  0xda   : > { %v323_v10 = vpop.permute.xlu1 %322  ;;  %v321_v14 = vpop.permute.xlu0 %320  ;;  %v884_v2 = vmul.f32 %v1766_v45, %v882_v54 }
  0xdb   : > { %v327_v21 = vadd.f32 %v323_v10, %v313_v5  ;;  %v326_v25 = vadd.f32 %v321_v14, %v312_v24  ;;  %v896_v5 = vstv %s1769_s20  ;;  %v411_v24 = vmul.f32 %v1560_v46, %v410_v58 }
  0xdc   : > { %802 = vrot.lane.b32.xlu1 %v797_v22, %s1345_s14  ;;  %800 = vrot.lane.b32.xlu0 %v796_v7, %s1345_s14  ;;  %v883_v22 = vmul.f32 %v1772_v50, %v882_v54  ;;  %v898_v44 = vmul.f32 %v1766_v45, %v896_v5  ;;  %v897_v1 = vmul.f32 %v1772_v50, %v896_v5  ;;  %v968_v58 = vstv %s1811_s28 }
  0xdd   : > { %v510_v5 = vstv %s1823_s4 }
  0xde   : > { %v337_v18 = vpop.permute.xlu1 %336  ;;  %v335_v23 = vpop.permute.xlu0 %334 }
  0xdf   : > { %v341_v27 = vadd.f32 %v337_v18, %v327_v21  ;;  %v340_v34 = vadd.f32 %v335_v23, %v326_v25  ;;  %v1798_v18 = vld [vmem:[%s1476_s8 + $0x3a] sm:$0x1f]  ;;  %v1804_v23 = vld [vmem:[%s1476_s8 + $0x32] sm:$0xff] }
  0xe0   : > { %825 = vrot.lane.b32.xlu1 %v820_v15, %s1344_s11  ;;  %823 = vrot.lane.b32.xlu0 %v819_v16, %s1344_s11 }
  0xe2   : > { %v351_v13 = vpop.permute.xlu1 %350  ;;  %v349_v39 = vpop.permute.xlu0 %348 }
  0xe3   : > { %v355_v37 = vadd.f32 %v351_v13, %v341_v27  ;;  %v354_v40 = vadd.f32 %v349_v39, %v340_v34  ;;  %v919_v27 = vmul.f32 %v1804_v23, %v918_v20 }
  0xe4   : > { %839 = vrot.lane.b32.xlu1 %v834_v26, %s1343_s22  ;;  %837 = vrot.lane.b32.xlu0 %v833_v29, %s1343_s22  ;;  %v920_v26 = vmul.f32 %v1798_v18, %v918_v20 }
  0xe5   : > { %v363_v41 = vadd.f32 %v361_v28, %v355_v37  ;;  %v362_v35 = vadd.f32 %v360_v36, %v354_v40  ;;  %v932_v28 = vstv %s1788_s25  ;;  %v462_v40 = vmul.f32 %v1575_v55, %v460_v31 }
  0xe6   : > { %v373_v49 = vpop.permute.xlu1 %372  ;;  %v371_v51 = vpop.permute.xlu0 %370  ;;  %v934_v37 = vmul.f32 %v1798_v18, %v932_v28 }
  0xe7   : > { %v377_v59 = vadd.f32 %v373_v49, %v363_v41  ;;  %v376_v62 = vadd.f32 %v371_v51, %v362_v35  ;;  %v946_v41 = vstv %s1801_s27  ;;  %v461_v35 = vmul.f32 %v1578_v57, %v460_v31 }
  0xe8   : > { %853 = vrot.lane.b32.xlu1 %v848_v33, %s1345_s14  ;;  %851 = vrot.lane.b32.xlu0 %v847_v42, %s1345_s14  ;;  %v933_v33 = vmul.f32 %v1804_v23, %v932_v28  ;;  %v948_v55 = vmul.f32 %v1798_v18, %v946_v41  ;;  %v947_v54 = vmul.f32 %v1804_v23, %v946_v41 }
  0xea   : > { %v387_v56 = vpop.permute.xlu1 %386  ;;  %v385_v61 = vpop.permute.xlu0 %384 }
  0xeb   : > { %v391_v3 = vadd.f32 %v387_v56, %v377_v59  ;;  %v390_v7 = vadd.f32 %v385_v61, %v376_v62  ;;  %v1830_v56 = vld [vmem:[%s1476_s8 + $0x3b] sm:$0x1f]  ;;  %v1836_v61 = vld [vmem:[%s1476_s8 + $0x33] sm:$0xff]  ;;  %s1143_s8 = sld [smem:[#allocation6 + $0x1c]] }
  0xec   : > { %875 = vrot.lane.b32.xlu1 %v870_v52, %s1344_s11  ;;  %873 = vrot.lane.b32.xlu0 %v869_v53, %s1344_s11 }
  0xee   : > { %v401_v9 = vpop.permute.xlu1 %400  ;;  %v399_v14 = vpop.permute.xlu0 %398 }
  0xef   : > { %v405_v10 = vadd.f32 %v401_v9, %v391_v3  ;;  %v404_v15 = vadd.f32 %v399_v14, %v390_v7  ;;  %v969_v3 = vmul.f32 %v1836_v61, %v968_v58 }
  0xf0   : > { %889 = vrot.lane.b32.xlu1 %v884_v2, %s1343_s22  ;;  %887 = vrot.lane.b32.xlu0 %v883_v22, %s1343_s22  ;;  %v970_v2 = vmul.f32 %v1830_v56, %v968_v58 }
  0xf1   : > { %v414_v16 = vadd.f32 %v412_v0, %v405_v10  ;;  %v413_v46 = vadd.f32 %v411_v24, %v404_v15  ;;  %v982_v0 = vstv %s1820_s30 }
  0xf2   : > { %v424_v21 = vpop.permute.xlu1 %423  ;;  %v422_v25 = vpop.permute.xlu0 %421  ;;  %v984_v10 = vmul.f32 %v1830_v56, %v982_v0  ;;  %v983_v15 = vmul.f32 %v1836_v61, %v982_v0 }
  0xf3   : > { %v428_v34 = vadd.f32 %v424_v21, %v414_v16  ;;  %v427_v36 = vadd.f32 %v422_v25, %v413_v46  ;;  %v996_v16 = vstv %s1833_s5  ;;  %v511_v46 = vmul.f32 %v1596_v6, %v510_v5 }
  0xf4   : > { %903 = vrot.lane.b32.xlu1 %v898_v44, %s1345_s14  ;;  %901 = vrot.lane.b32.xlu0 %v897_v1, %s1345_s14  ;;  %v512_v44 = vmul.f32 %v1593_v4, %v510_v5 }
  0xf6   : > { %v438_v29 = vpop.permute.xlu1 %437  ;;  %v436_v13 = vpop.permute.xlu0 %435 }
  0xf7   : > { %v442_v39 = vadd.f32 %v438_v29, %v428_v34  ;;  %v441_v42 = vadd.f32 %v436_v13, %v427_v36  ;;  %v997_v29 = vmul.f32 %v1836_v61, %v996_v16  ;;  %v560_v13 = vstv %s1143_s8 }
  0xf8   : > { %925 = vrot.lane.b32.xlu1 %v920_v26, %s1344_s11  ;;  %923 = vrot.lane.b32.xlu0 %v919_v27, %s1344_s11  ;;  %v998_v27 = vmul.f32 %v1830_v56, %v996_v16 }
  0xfa   : > { %v452_v48 = vpop.permute.xlu1 %451  ;;  %v450_v51 = vpop.permute.xlu0 %449 }
  0xfb   : > { %v456_v49 = vadd.f32 %v452_v48, %v442_v39  ;;  %v455_v52 = vadd.f32 %v450_v51, %v441_v42  ;;  %v561_v48 = vmul.f32 %v1614_v19, %v560_v13 }
  0xfc   : > { %939 = vrot.lane.b32.xlu1 %v934_v37, %s1343_s22  ;;  %937 = vrot.lane.b32.xlu0 %v933_v33, %s1343_s22  ;;  %v562_v33 = vmul.f32 %v1611_v17, %v560_v13 }
  0xfd   : > { %v464_v53 = vadd.f32 %v462_v40, %v456_v49  ;;  %v463_v57 = vadd.f32 %v461_v35, %v455_v52 }
  0xfe   : > { %v474_v59 = vpop.permute.xlu1 %473  ;;  %v472_v62 = vpop.permute.xlu0 %471 }
  0xff   : > { %v478_v7 = vadd.f32 %v474_v59, %v464_v53  ;;  %v477_v24 = vadd.f32 %v472_v62, %v463_v57 }
 0x100   : > { %953 = vrot.lane.b32.xlu1 %v948_v55, %s1345_s14  ;;  %951 = vrot.lane.b32.xlu0 %v947_v54, %s1345_s14 }
 0x102   : > { %v488_v22 = vpop.permute.xlu1 %487  ;;  %v486_v9 = vpop.permute.xlu0 %485 }
 0x103   : > { %v492_v14 = vadd.f32 %v488_v22, %v478_v7  ;;  %v491_v1 = vadd.f32 %v486_v9, %v477_v24 }
 0x104   : > { %975 = vrot.lane.b32.xlu1 %v970_v2, %s1344_s11  ;;  %973 = vrot.lane.b32.xlu0 %v969_v3, %s1344_s11  ;;  %s1155_s11 = sld [smem:[#allocation6 + $0x24]] }
 0x106   : > { %v502_v20 = vpop.permute.xlu1 %501  ;;  %v500_v25 = vpop.permute.xlu0 %499 }
 0x107   : > { %v506_v21 = vadd.f32 %v502_v20, %v492_v14  ;;  %v505_v26 = vadd.f32 %v500_v25, %v491_v1 }
 0x108   : > { %989 = vrot.lane.b32.xlu1 %v984_v10, %s1343_s22  ;;  %987 = vrot.lane.b32.xlu0 %v983_v15, %s1343_s22  ;;  %s1149_s22 = sld [smem:[#allocation6 + $0x20]] }
 0x109   : > { %v514_v28 = vadd.f32 %v512_v44, %v506_v21  ;;  %v513_v4 = vadd.f32 %v511_v46, %v505_v26 }
 0x10a   : > { %v524_v31 = vpop.permute.xlu1 %523  ;;  %v522_v34 = vpop.permute.xlu0 %521  ;;  %v661_v46 = vstv %s1155_s11 }
 0x10b   : > { %v528_v36 = vadd.f32 %v524_v31, %v514_v28  ;;  %v527_v39 = vadd.f32 %v522_v34, %v513_v4 }
 0x10c   : > { %1003 = vrot.lane.b32.xlu1 %v998_v27, %s1345_s14  ;;  %1001 = vrot.lane.b32.xlu0 %v997_v29, %s1345_s14  ;;  %v662_v29 = vmul.f32 %v1652_v47, %v661_v46  ;;  %s1161_s14 = sld [smem:[#allocation6 + $0x28]] }
 0x10e   : > { %v538_v6 = vpop.permute.xlu1 %537  ;;  %v536_v37 = vpop.permute.xlu0 %535  ;;  %v611_v57 = vstv %s1149_s22 }
 0x10f   : > { %v542_v40 = vadd.f32 %v538_v6, %v528_v36  ;;  %v541_v41 = vadd.f32 %v536_v37, %v527_v39  ;;  %v613_v17 = vmul.f32 %v1629_v30, %v611_v57  ;;  %v612_v19 = vmul.f32 %v1632_v32, %v611_v57 }
 0x110   : > { %v663_v32 = vmul.f32 %v1647_v43, %v661_v46 }
 0x112   : > { %v552_v42 = vpop.permute.xlu1 %551  ;;  %v550_v49 = vpop.permute.xlu0 %549 }
 0x113   : > { %v556_v35 = vadd.f32 %v552_v42, %v542_v40  ;;  %v555_v51 = vadd.f32 %v550_v49, %v541_v41  ;;  %v711_v40 = vstv %s1161_s14 }
 0x114   : > { %v713_v43 = vmul.f32 %v1671_v60, %v711_v40  ;;  %v712_v47 = vmul.f32 %v1676_v63, %v711_v40 }
 0x115   : > { %v564_v52 = vadd.f32 %v562_v33, %v556_v35  ;;  %v563_v53 = vadd.f32 %v561_v48, %v555_v51 }
 0x116   : > { %v574_v55 = vpop.permute.xlu1 %573  ;;  %v572_v54 = vpop.permute.xlu0 %571 }
 0x117   : > { %v578_v59 = vadd.f32 %v574_v55, %v564_v52  ;;  %v577_v2 = vadd.f32 %v572_v54, %v563_v53 }
 0x11a   : > { %v588_v58 = vpop.permute.xlu1 %587  ;;  %v586_v62 = vpop.permute.xlu0 %585 }
 0x11b   : > { %v592_v3 = vadd.f32 %v588_v58, %v578_v59  ;;  %v591_v0 = vadd.f32 %v586_v62, %v577_v2  ;;  %v761_v62 = vstv %s1167_s6 }
 0x11c   : > { %v763_v60 = vmul.f32 %v1702_v11, %v761_v62  ;;  %v762_v63 = vmul.f32 %v1708_v38, %v761_v62 }
 0x11e   : > { %v602_v22 = vpop.permute.xlu1 %601  ;;  %v600_v7 = vpop.permute.xlu0 %599 }
 0x11f   : > { %v606_v5 = vadd.f32 %v602_v22, %v592_v3  ;;  %v605_v9 = vadd.f32 %v600_v7, %v591_v0 }
 0x121   : > { %v615_v24 = vadd.f32 %v613_v17, %v606_v5  ;;  %v614_v14 = vadd.f32 %v612_v19, %v605_v9 }
 0x122   : > { %v625_v10 = vpop.permute.xlu1 %624  ;;  %v623_v15 = vpop.permute.xlu0 %622 }
 0x123   : > { %v629_v16 = vadd.f32 %v625_v10, %v615_v24  ;;  %v628_v20 = vadd.f32 %v623_v15, %v614_v14 }
 0x126   : > { %v639_v44 = vpop.permute.xlu1 %638  ;;  %v637_v1 = vpop.permute.xlu0 %636 }
 0x127   : > { %v643_v21 = vadd.f32 %v639_v44, %v629_v16  ;;  %v642_v25 = vadd.f32 %v637_v1, %v628_v20  ;;  %v812_v16 = vstv %s1173_s7 }
 0x128   : > { %v814_v11 = vmul.f32 %v1734_v8, %v812_v16  ;;  %v813_v38 = vmul.f32 %v1740_v12, %v812_v16 }
 0x12a   : > { %v653_v30 = vpop.permute.xlu1 %652  ;;  %v651_v27 = vpop.permute.xlu0 %650 }
 0x12b   : > { %v657_v26 = vadd.f32 %v653_v30, %v643_v21  ;;  %v656_v28 = vadd.f32 %v651_v27, %v642_v25 }
 0x12d   : > { %v665_v4 = vadd.f32 %v663_v32, %v657_v26  ;;  %v664_v6 = vadd.f32 %v662_v29, %v656_v28 }
 0x12e   : > { %v675_v31 = vpop.permute.xlu1 %674  ;;  %v673_v34 = vpop.permute.xlu0 %672 }
 0x12f   : > { %v679_v36 = vadd.f32 %v675_v31, %v665_v4  ;;  %v678_v39 = vadd.f32 %v673_v34, %v664_v6  ;;  %v862_v6 = vstv %s1179_s23 }
 0x130   : > { %v864_v8 = vmul.f32 %v1766_v45, %v862_v6  ;;  %v863_v12 = vmul.f32 %v1772_v50, %v862_v6 }
 0x132   : > { %v689_v13 = vpop.permute.xlu1 %688  ;;  %v687_v37 = vpop.permute.xlu0 %686 }
 0x133   : > { %v693_v33 = vadd.f32 %v689_v13, %v679_v36  ;;  %v692_v41 = vadd.f32 %v687_v37, %v678_v39 }
 0x136   : > { %v703_v42 = vpop.permute.xlu1 %702  ;;  %v701_v35 = vpop.permute.xlu0 %700 }
 0x137   : > { %v707_v48 = vadd.f32 %v703_v42, %v693_v33  ;;  %v706_v49 = vadd.f32 %v701_v35, %v692_v41 }
 0x139   : > { %v715_v52 = vadd.f32 %v713_v43, %v707_v48  ;;  %v714_v53 = vadd.f32 %v712_v47, %v706_v49 }
 0x13a   : > { %v725_v51 = vpop.permute.xlu1 %724  ;;  %v723_v55 = vpop.permute.xlu0 %722 }
 0x13b   : > { %v729_v58 = vadd.f32 %v725_v51, %v715_v52  ;;  %v728_v59 = vadd.f32 %v723_v55, %v714_v53  ;;  %v912_v52 = vstv %s1185_s29 }
 0x13c   : > { %v914_v45 = vmul.f32 %v1798_v18, %v912_v52  ;;  %v913_v50 = vmul.f32 %v1804_v23, %v912_v52 }
 0x13e   : > { %v739_v54 = vpop.permute.xlu1 %738  ;;  %v737_v57 = vpop.permute.xlu0 %736 }
 0x13f   : > { %v743_v2 = vadd.f32 %v739_v54, %v729_v58  ;;  %v742_v3 = vadd.f32 %v737_v57, %v728_v59 }
 0x142   : > { %v753_v17 = vpop.permute.xlu1 %752  ;;  %v751_v22 = vpop.permute.xlu0 %750 }
 0x143   : > { %v757_v0 = vadd.f32 %v753_v17, %v743_v2  ;;  %v756_v19 = vadd.f32 %v751_v22, %v742_v3 }
 0x145   : > { %v765_v7 = vadd.f32 %v763_v60, %v757_v0  ;;  %v764_v24 = vadd.f32 %v762_v63, %v756_v19  ;;  %v962_v63 = vstv %s1191_s9 }
 0x146   : > { %v775_v5 = vpop.permute.xlu1 %774  ;;  %v773_v9 = vpop.permute.xlu0 %772 }
 0x147   : > { %v779_v14 = vadd.f32 %v775_v5, %v765_v7  ;;  %v778_v44 = vadd.f32 %v773_v9, %v764_v24 }
 0x14a   : > { %v789_v10 = vpop.permute.xlu1 %788  ;;  %v787_v15 = vpop.permute.xlu0 %786 }
 0x14b   : > { %v793_v1 = vadd.f32 %v789_v10, %v779_v14  ;;  %v792_v20 = vadd.f32 %v787_v15, %v778_v44  ;;  %v964_v10 = vmul.f32 %v1830_v56, %v962_v63  ;;  %v963_v14 = vmul.f32 %v1836_v61, %v962_v63 }
 0x14e   : > { %v803_v46 = vpop.permute.xlu1 %802  ;;  %v801_v25 = vpop.permute.xlu0 %800 }
 0x14f   : > { %v807_v21 = vadd.f32 %v803_v46, %v793_v1  ;;  %v806_v30 = vadd.f32 %v801_v25, %v792_v20 }
 0x151   : > { %v816_v27 = vadd.f32 %v814_v11, %v807_v21  ;;  %v815_v28 = vadd.f32 %v813_v38, %v806_v30  ;;  %v1010_v38 = vstv %s1009_s10 }
 0x152   : > { %v826_v26 = vpop.permute.xlu1 %825  ;;  %v824_v32 = vpop.permute.xlu0 %823 }
 0x153   : > { %v830_v31 = vadd.f32 %v826_v26, %v816_v27  ;;  %v829_v34 = vadd.f32 %v824_v32, %v815_v28 }
 0x156   : > { %v840_v29 = vpop.permute.xlu1 %839  ;;  %v838_v4 = vpop.permute.xlu0 %837 }
 0x157   : > { %v844_v13 = vadd.f32 %v840_v29, %v830_v31  ;;  %v843_v36 = vadd.f32 %v838_v4, %v829_v34 }
 0x15a   : > { %v854_v37 = vpop.permute.xlu1 %853  ;;  %v852_v40 = vpop.permute.xlu0 %851 }
 0x15b   : > { %v858_v39 = vadd.f32 %v854_v37, %v844_v13  ;;  %v857_v33 = vadd.f32 %v852_v40, %v843_v36 }
 0x15d   : > { %v866_v42 = vadd.f32 %v864_v8, %v858_v39  ;;  %v865_v35 = vadd.f32 %v863_v12, %v857_v33 }
 0x15e   : > { %v876_v41 = vpop.permute.xlu1 %875  ;;  %v874_v48 = vpop.permute.xlu0 %873 }
 0x15f   : > { %v880_v49 = vadd.f32 %v876_v41, %v866_v42  ;;  %v879_v51 = vadd.f32 %v874_v48, %v865_v35 }
 0x162   : > { %v890_v43 = vpop.permute.xlu1 %889  ;;  %v888_v47 = vpop.permute.xlu0 %887 }
 0x163   : > { %v894_v55 = vadd.f32 %v890_v43, %v880_v49  ;;  %v893_v53 = vadd.f32 %v888_v47, %v879_v51 }
 0x166   : > { %v904_v54 = vpop.permute.xlu1 %903  ;;  %v902_v57 = vpop.permute.xlu0 %901 }
 0x167   : > { %v908_v58 = vadd.f32 %v904_v54, %v894_v55  ;;  %v907_v59 = vadd.f32 %v902_v57, %v893_v53 }
 0x169   : > { %v916_v2 = vadd.f32 %v914_v45, %v908_v58  ;;  %v915_v17 = vadd.f32 %v913_v50, %v907_v59 }
 0x16a   : > { %v926_v62 = vpop.permute.xlu1 %925  ;;  %v924_v3 = vpop.permute.xlu0 %923 }
 0x16b   : > { %v930_v22 = vadd.f32 %v926_v62, %v916_v2  ;;  %v929_v19 = vadd.f32 %v924_v3, %v915_v17 }
 0x16e   : > { %v940_v0 = vpop.permute.xlu1 %939  ;;  %v938_v60 = vpop.permute.xlu0 %937 }
 0x16f   : > { %v944_v5 = vadd.f32 %v940_v0, %v930_v22  ;;  %v943_v7 = vadd.f32 %v938_v60, %v929_v19 }
 0x172   : > { %v954_v9 = vpop.permute.xlu1 %953  ;;  %v952_v18 = vpop.permute.xlu0 %951 }
 0x173   : > { %v958_v24 = vadd.f32 %v954_v9, %v944_v5  ;;  %v957_v23 = vadd.f32 %v952_v18, %v943_v7 }
 0x175   : > { %v966_v44 = vadd.f32 %v964_v10, %v958_v24  ;;  %v965_v1 = vadd.f32 %v963_v14, %v957_v23 }
 0x176   : > { %v976_v15 = vpop.permute.xlu1 %975  ;;  %v974_v16 = vpop.permute.xlu0 %973 }
 0x177   : > { %v980_v46 = vadd.f32 %v976_v15, %v966_v44  ;;  %v979_v25 = vadd.f32 %v974_v16, %v965_v1 }
 0x17a   : > { %v990_v20 = vpop.permute.xlu1 %989  ;;  %v988_v21 = vpop.permute.xlu0 %987 }
 0x17b   : > { %v994_v11 = vadd.f32 %v990_v20, %v980_v46  ;;  %v993_v30 = vadd.f32 %v988_v21, %v979_v25 }
 0x17e   : > { %v1004_v26 = vpop.permute.xlu1 %1003  ;;  %v1002_v27 = vpop.permute.xlu0 %1001 }
 0x17f   : > { %v1008_v56 = vadd.f32 %v1004_v26, %v994_v11  ;;  %v1007_v61 = vadd.f32 %v1002_v27, %v993_v30 }
 0x181   : > { %v1012_v32 = vadd.f32 %v1010_v38, %v1008_v56  ;;  %v1011_v28 = vadd.f32 %v1010_v38, %v1007_v61 }
 0x183   : > { %1016 = vst.msk [vmem:[%s205_s19 + $0x8] sm:$0x1f] %vm1015_vm0, %v1012_v32 }
 0x184   : > { %1014 = vst.msk [vmem:[%s205_s19] sm:$0xff] %vm1013_vm1, %v1011_v28 }
 0x185 PF: > { %p15_p13 = scmp.ge.s32.totalorder %s1391_s18, 4   ;;  %s1905_s14 = smov %s1329_s15 }
 0x186   : > { %s1906_s15 = smov %s1333_s16  ;;  %s1907_s16 = smov %s1401_s21 }
 0x187   : > { %s1908_s17 = smov %s1391_s18  ;;  %17 = sbr.rel (!%p15_p13) target bundleno = 6 (0x6), region = 80 }
 0x18e   :  { %1038 = vsyncpa [#allocation4], 1 }
 0x18f   :  { %1040 = vsyncpa [#allocation4 + $0x1], 1 }
 0x190   :  { %1041 = vsyncpa [#allocation5], 1 }
 0x191   :  { %1043 = vsyncpa [#allocation5 + $0x1], 1 }

</bundles_post_ra>
